<compile_context>
chip_gen: v7x
topology: tpu7x:2x2x1
jax: 0.10.0
libtpu: 0.0.40
codegen_flags: <defaults>
</compile_context>

<pallas_src>
import functools
import math

import numpy as np
import jax
import jax.numpy as jnp
from jax import lax
from jax.experimental import pallas as pl
from jax.experimental.pallas import tpu as pltpu

LN_EPS = 1e-5  # nn.LayerNorm default


# ----------------------------- small math helpers -----------------------------
def _silu(x):
    return x * jax.nn.sigmoid(x)


def _softplus(x):
    # matches F.softplus (threshold=20)
    return jnp.where(x > 20.0, x, jnp.log(1.0 + jnp.exp(x)))


def _gelu_tanh(x):
    # tanh approximation of GELU (one EUP tanh, short VALU chain).
    c = 0.7978845608028654  # sqrt(2/pi)
    return 0.5 * x * (1.0 + jnp.tanh(c * (x + 0.044715 * x * x * x)))


def _layernorm(x, g, b):
    mu = jnp.mean(x, axis=-1, keepdims=True)
    var = jnp.mean((x - mu) ** 2, axis=-1, keepdims=True)
    return (x - mu) * lax.rsqrt(var + LN_EPS) * g + b


# -------------------- Fully fused MambaLayer kernel (per batch) -----------------
def _layer_kernel(x_ref, g1_ref, b1_ref, win_ref, cw_ref, cb_ref, wdbc_ref,
                  dtb_ref, at_ref, dvec_ref, wout_ref,
                  g2_ref, b2_ref, g3_ref, b3_ref,
                  w1_ref, fb1_ref, w2_ref, fb2_ref,
                  o_ref, dA_scr, dBu_scr,
                  *, L, D, d_inner, d_state, d_conv, chunk):
    x = x_ref[0]                                                     # (L, D) f32
    xn = _layernorm(x, g1_ref[...], b1_ref[...]).astype(jnp.bfloat16)

    # in_proj: single lane-dense bf16 matmul for xr || z, f32 accumulate.
    xz = jnp.dot(xn, win_ref[...], preferred_element_type=jnp.float32)  # (L, 2*d_inner)
    xr = xz[:, :d_inner]
    z = xz[:, d_inner:]

    # causal depthwise conv1d, entirely in registers (shift-by-one per tap).
    cwv = cw_ref[...]                                                 # (d_conv, d_inner)
    u = cb_ref[...] + xr * cwv[d_conv - 1:d_conv, :]
    zrow = jnp.zeros((1, d_inner), jnp.float32)
    shifted = xr
    for k in range(d_conv - 2, -1, -1):
        shifted = jnp.concatenate([zrow, shifted[:L - 1, :]], axis=0)
        u = u + shifted * cwv[k:k + 1, :]
    u = _silu(u)

    # fused dt / B / C projections: one bf16 MXU matmul over the concatenated
    # (d_inner, d_inner + 2*d_state) weight; scan math stays f32.
    dbc = jnp.dot(u.astype(jnp.bfloat16), wdbc_ref[...],
                  preferred_element_type=jnp.float32)                 # (L, d_inner+2S)
    delta = _softplus(dbc[:, :d_inner] + dtb_ref[...])                # (L, d_inner)
    Bc = dbc[:, d_inner:d_inner + d_state]                            # (L, d_state)
    Cc = dbc[:, d_inner + d_state:]                                   # (L, d_state)
    du = delta * u                                                    # (L, d_inner)
    A_T = at_ref[...]                                                 # (d_state, d_inner)

    g2 = g2_ref[...]; b2 = b2_ref[...]
    g3 = g3_ref[...]; b3 = b3_ref[...]
    fb1 = fb1_ref[...]; fb2 = fb2_ref[...]
    dvec = dvec_ref[...]

    # chunked selective scan with per-chunk finalize.
    h = jnp.zeros((d_state, d_inner), jnp.float32)
    for c0 in range(0, L, chunk):
        tc = min(chunk, L - c0)

        # ---- vectorized precompute (exp fused, one contiguous store each) ----
        d_c = delta[c0:c0 + tc]                                       # (tc, d_inner)
        dA = jnp.exp(d_c[:, None, :] * A_T[None, :, :])               # (tc, S, d_inner)
        dA_scr[0:tc] = dA
        dBu = Bc[c0:c0 + tc][:, :, None] * du[c0:c0 + tc][:, None, :]
        dBu_scr[0:tc] = dBu

        # ---- serial recurrence: VPU fma; h_t overwrites the consumed dA slot ----
        def step(t, hc):
            hc = dA_scr[t] * hc + dBu_scr[t]
            dA_scr[t] = hc
            return hc

        unroll = True if tc <= 16 else (8 if tc % 8 == 0 else 1)
        h = lax.fori_loop(0, tc, step, h, unroll=unroll)

        # ---- batched readout: contiguous load + reduce over the state axis ----
        h_all = dA_scr[0:tc]                                          # (tc, S, d_inner)
        y_c = jnp.sum(Cc[c0:c0 + tc][:, :, None] * h_all, axis=1)     # (tc, d_inner)

        # ---- per-chunk finalize: D-skip, gating, out_proj, residual, MLP, LNs ----
        y_c = (y_c + u[c0:c0 + tc] * dvec) * _silu(z[c0:c0 + tc])
        x1 = x[c0:c0 + tc] + jnp.dot(y_c.astype(jnp.bfloat16), wout_ref[...],
                                     preferred_element_type=jnp.float32)   # (tc, D)
        xn2 = _layernorm(x1, g2, b2).astype(jnp.bfloat16)
        hmid = _gelu_tanh(jnp.dot(xn2, w1_ref[...],
                                  preferred_element_type=jnp.float32) + fb1)
        m = jnp.dot(hmid.astype(jnp.bfloat16), w2_ref[...],
                    preferred_element_type=jnp.float32) + fb2
        o_ref[0, c0:c0 + tc, :] = _layernorm(x1 + m, g3, b3)


def mamba_layer_forward(x, p, *, chunk=None):
    B, L, D = x.shape
    mp = p["mamba"]
    d_inner = mp["wx_t"].shape[1]
    d_state = int(p["d_state"])
    d_conv = int(p["d_conv"])
    H = p["fc1_wt"].shape[1]
    if chunk is None:
        # 2 x chunk*d_state*d_inner f32 scratch; 64 keeps v7x (64 MiB VMEM)
        # comfortable at production d_inner.  Sweep upward on v5e/v6e.
        chunk = min(L, 64)

    # host-side prep: fused, bf16 weights for the MXU projections.
    w_in = jnp.concatenate([mp["wx_t"], mp["wz_t"]], axis=1).astype(jnp.bfloat16)
    w_dt = jnp.dot(mp["wdtin_t"], mp["wdt_t"])                 # (d_inner, d_inner)
    w_dbc = jnp.concatenate([w_dt, mp["wb_t"], mp["wc_t"]],
                            axis=1).astype(jnp.bfloat16)       # (d_inner, d_inner+2S)
    w_out = mp["wout_t"].astype(jnp.bfloat16)
    w1 = p["fc1_wt"].astype(jnp.bfloat16)
    w2 = p["fc2_wt"].astype(jnp.bfloat16)

    kern = functools.partial(_layer_kernel, L=L, D=D, d_inner=d_inner,
                             d_state=d_state, d_conv=d_conv, chunk=chunk)

    def full(shape):
        n = len(shape)
        return pl.BlockSpec(shape, lambda b, _n=n: (0,) * _n)

    return pl.pallas_call(
        kern,
        out_shape=jax.ShapeDtypeStruct((B, L, D), jnp.float32),
        grid=(B,),
        in_specs=[
            pl.BlockSpec((1, L, D), lambda b: (b, 0, 0)),
            full((1, D)), full((1, D)),
            full((D, 2 * d_inner)),
            full((d_conv, d_inner)), full((1, d_inner)),
            full((d_inner, d_inner + 2 * d_state)),
            full((1, d_inner)),
            full((d_state, d_inner)),
            full((1, d_inner)),
            full((d_inner, D)),
            full((1, D)), full((1, D)), full((1, D)), full((1, D)),
            full((D, H)), full((1, H)),
            full((H, D)), full((1, D)),
        ],
        out_specs=pl.BlockSpec((1, L, D), lambda b: (b, 0, 0)),
        scratch_shapes=[
            pltpu.VMEM((chunk, d_state, d_inner), jnp.float32),   # dA, reused for h_t
            pltpu.VMEM((chunk, d_state, d_inner), jnp.float32),   # dBu
        ],
        compiler_params=pltpu.CompilerParams(
            dimension_semantics=("parallel",)),
    )(x, p["g1"].reshape(1, D), p["b1"].reshape(1, D),
      w_in, mp["conv_w"], mp["conv_b"], w_dbc, mp["dt_bias"],
      mp["a_t"], mp["d_vec"], w_out,
      p["g2"].reshape(1, D), p["b2"].reshape(1, D),
      p["g3"].reshape(1, D), p["b3"].reshape(1, D),
      w1, p["fc1_b"].reshape(1, H), w2, p["fc2_b"].reshape(1, D))


# --------------------------- pure-JAX reference (check) --------------------------
def ref_forward(x, p):
    def ln(t, g, b):
        mu = t.mean(-1, keepdims=True)
        var = ((t - mu) ** 2).mean(-1, keepdims=True)
        return (t - mu) / jnp.sqrt(var + LN_EPS) * g + b

    gelu = lambda v: 0.5 * v * (1.0 + jax.scipy.special.erf(v / jnp.sqrt(2.0)))
    mp = p["mamba"]
    B, L, D = x.shape
    d_inner = mp["wx_t"].shape[1]
    d_state, d_conv = p["d_state"], p["d_conv"]

    xn = ln(x, p["g1"], p["b1"])
    xr = jnp.einsum("bld,de->ble", xn, mp["wx_t"])
    z = jnp.einsum("bld,de->ble", xn, mp["wz_t"])
    u = jnp.broadcast_to(mp["conv_b"], (B, L, d_inner))
    for k in range(d_conv):
        shift = d_conv - 1 - k
        xs = xr if shift == 0 else jnp.concatenate(
            [jnp.zeros((B, shift, d_inner), jnp.float32), xr[:, :L - shift]], axis=1)
        u = u + xs * mp["conv_w"][k]
    u = _silu(u)
    dt_in = jnp.einsum("ble,er->blr", u, mp["wdtin_t"])
    Bc = jnp.einsum("ble,en->bln", u, mp["wb_t"])
    Cc = jnp.einsum("ble,en->bln", u, mp["wc_t"])
    dt = jnp.einsum("blr,re->ble", dt_in, mp["wdt_t"]) + mp["dt_bias"]
    delta = _softplus(dt)
    A = mp["a_t"].T                                     # (d_inner, d_state)
    hst = jnp.zeros((B, d_inner, d_state), jnp.float32)
    ys = []
    for l in range(L):
        dA = jnp.exp(delta[:, l, :, None] * A[None])
        dBu = delta[:, l, :, None] * u[:, l, :, None] * Bc[:, l, None, :]
        hst = dA * hst + dBu
        ys.append(jnp.sum(hst * Cc[:, l, None, :], axis=-1))
    y = jnp.stack(ys, axis=1)                           # (B, L, d_inner)
    y = y + u * mp["d_vec"]
    y = y * _silu(z)
    m = jnp.einsum("ble,ed->bld", y, mp["wout_t"])

    x1 = x + m
    xn2 = ln(x1, p["g2"], p["b2"])
    hmlp = gelu(jnp.einsum("bld,dh->blh", xn2, p["fc1_wt"]) + p["fc1_b"])
    mlp = jnp.einsum("blh,hd->bld", hmlp, p["fc2_wt"]) + p["fc2_b"]
    return ln(x1 + mlp, p["g3"], p["b3"])


# ------------------------------- parameter init ----------------------------------
def make_params(key, dim=32, d_state=16, d_conv=4, expand=2, mlp_ratio=4):
    d_inner = expand * dim
    dt_rank = math.ceil(dim / 16)
    hidden = int(dim * mlp_ratio)
    ks = jax.random.split(key, 11)

    def n(k, shape, std=0.02):
        return jax.random.normal(k, shape, jnp.float32) * std

    in_proj_w = n(ks[0], (2 * d_inner, dim))
    conv_w = n(ks[1], (d_inner, d_conv), 0.2)
    conv_b = n(ks[2], (d_inner,), 0.1)
    x_proj_w = n(ks[3], (dt_rank + 2 * d_state, d_inner))
    dt_proj_w = n(ks[4], (d_inner, dt_rank), dt_rank ** -0.5)
    dt_bias = n(ks[5], (d_inner,), 0.1)
    A_log = jnp.broadcast_to(
        jnp.log(jnp.arange(1, d_state + 1, dtype=jnp.float32)), (d_inner, d_state))
    out_proj_w = n(ks[6], (dim, d_inner))

    mamba_p = dict(
        wx_t=in_proj_w[:d_inner].T, wz_t=in_proj_w[d_inner:].T,
        conv_w=conv_w.T, conv_b=conv_b.reshape(1, d_inner),
        wdtin_t=x_proj_w[:dt_rank].T,
        wb_t=x_proj_w[dt_rank:dt_rank + d_state].T,
        wc_t=x_proj_w[dt_rank + d_state:].T,
        wdt_t=dt_proj_w.T, dt_bias=dt_bias.reshape(1, d_inner),
        a_t=(-jnp.exp(A_log)).T,
        d_vec=jnp.ones((1, d_inner), jnp.float32),
        wout_t=out_proj_w.T,
    )
    return dict(
        d_state=d_state, d_conv=d_conv, mamba=mamba_p,
        g1=jnp.ones((dim,), jnp.float32), b1=jnp.zeros((dim,), jnp.float32),
        g2=jnp.ones((dim,), jnp.float32), b2=jnp.zeros((dim,), jnp.float32),
        g3=jnp.ones((dim,), jnp.float32), b3=jnp.zeros((dim,), jnp.float32),
        fc1_wt=n(ks[7], (hidden, dim)).T, fc1_b=n(ks[8], (hidden,), 0.02),
        fc2_wt=n(ks[9], (dim, hidden)).T, fc2_b=n(ks[10], (dim,), 0.02),
    )


if __name__ == "__main__":
    key = jax.random.PRNGKey(0)
    kx, kp = jax.random.split(key)
    B, L, dim = 2, 8, 32
    x = jax.random.normal(kx, (B, L, dim), jnp.float32)
    params = make_params(kp, dim=dim)

    out = mamba_layer_forward(x, params)
    out = jax.block_until_ready(out)
    assert out.shape == (B, L, dim)

    ref = ref_forward(x, params)
    np.testing.assert_allclose(np.asarray(out), np.asarray(ref), rtol=2e-2, atol=2e-2)
    print("KERNEL_OK")
</pallas_src>

<mosaic_0001>
module attributes {stable_mosaic.version = 11 : i64} {
  func.func @_layer_kernel(%arg0: i32, %arg1: memref<1x8x32xf32, #tpu.memory_space<vmem>>, %arg2: memref<1x32xf32, #tpu.memory_space<vmem>>, %arg3: memref<1x32xf32, #tpu.memory_space<vmem>>, %arg4: memref<32x128xbf16, #tpu.memory_space<vmem>>, %arg5: memref<4x64xf32, #tpu.memory_space<vmem>>, %arg6: memref<1x64xf32, #tpu.memory_space<vmem>>, %arg7: memref<64x96xbf16, #tpu.memory_space<vmem>>, %arg8: memref<1x64xf32, #tpu.memory_space<vmem>>, %arg9: memref<16x64xf32, #tpu.memory_space<vmem>>, %arg10: memref<1x64xf32, #tpu.memory_space<vmem>>, %arg11: memref<64x32xbf16, #tpu.memory_space<vmem>>, %arg12: memref<1x32xf32, #tpu.memory_space<vmem>>, %arg13: memref<1x32xf32, #tpu.memory_space<vmem>>, %arg14: memref<1x32xf32, #tpu.memory_space<vmem>>, %arg15: memref<1x32xf32, #tpu.memory_space<vmem>>, %arg16: memref<32x128xbf16, #tpu.memory_space<vmem>>, %arg17: memref<1x128xf32, #tpu.memory_space<vmem>>, %arg18: memref<128x32xbf16, #tpu.memory_space<vmem>>, %arg19: memref<1x32xf32, #tpu.memory_space<vmem>>, %arg20: memref<1x8x32xf32, #tpu.memory_space<vmem>>, %arg21: memref<8x16x64xf32, #tpu.memory_space<vmem>>, %arg22: memref<8x16x64xf32, #tpu.memory_space<vmem>>) attributes {dimension_semantics = [#tpu.dimension_semantics<parallel>], iteration_bounds = array<i64: 2>, scalar_prefetch = 0 : i64, scratch_operands = 2 : i64, tpu.core_type = #tpu.core_type<tc>, window_params = [{transform_indices = @transform_0, window_bounds = array<i64: 1, 8, 32>}, {pipeline_mode = #tpu.pipeline_mode<synchronous>, transform_indices = @transform_1, window_bounds = array<i64: 1, 32>}, {pipeline_mode = #tpu.pipeline_mode<synchronous>, transform_indices = @transform_2, window_bounds = array<i64: 1, 32>}, {pipeline_mode = #tpu.pipeline_mode<synchronous>, transform_indices = @transform_3, window_bounds = array<i64: 32, 128>}, {pipeline_mode = #tpu.pipeline_mode<synchronous>, transform_indices = @transform_4, window_bounds = array<i64: 4, 64>}, {pipeline_mode = #tpu.pipeline_mode<synchronous>, transform_indices = @transform_5, window_bounds = array<i64: 1, 64>}, {pipeline_mode = #tpu.pipeline_mode<synchronous>, transform_indices = @transform_6, window_bounds = array<i64: 64, 96>}, {pipeline_mode = #tpu.pipeline_mode<synchronous>, transform_indices = @transform_7, window_bounds = array<i64: 1, 64>}, {pipeline_mode = #tpu.pipeline_mode<synchronous>, transform_indices = @transform_8, window_bounds = array<i64: 16, 64>}, {pipeline_mode = #tpu.pipeline_mode<synchronous>, transform_indices = @transform_9, window_bounds = array<i64: 1, 64>}, {pipeline_mode = #tpu.pipeline_mode<synchronous>, transform_indices = @transform_10, window_bounds = array<i64: 64, 32>}, {pipeline_mode = #tpu.pipeline_mode<synchronous>, transform_indices = @transform_11, window_bounds = array<i64: 1, 32>}, {pipeline_mode = #tpu.pipeline_mode<synchronous>, transform_indices = @transform_12, window_bounds = array<i64: 1, 32>}, {pipeline_mode = #tpu.pipeline_mode<synchronous>, transform_indices = @transform_13, window_bounds = array<i64: 1, 32>}, {pipeline_mode = #tpu.pipeline_mode<synchronous>, transform_indices = @transform_14, window_bounds = array<i64: 1, 32>}, {pipeline_mode = #tpu.pipeline_mode<synchronous>, transform_indices = @transform_15, window_bounds = array<i64: 32, 128>}, {pipeline_mode = #tpu.pipeline_mode<synchronous>, transform_indices = @transform_16, window_bounds = array<i64: 1, 128>}, {pipeline_mode = #tpu.pipeline_mode<synchronous>, transform_indices = @transform_17, window_bounds = array<i64: 128, 32>}, {pipeline_mode = #tpu.pipeline_mode<synchronous>, transform_indices = @transform_18, window_bounds = array<i64: 1, 32>}, {transform_indices = @transform_19, window_bounds = array<i64: 1, 8, 32>}]} {
    %c0 = arith.constant 0 : index
    %c0_0 = arith.constant 0 : index
    %c0_1 = arith.constant 0 : index
    %0 = vector.load %arg1[%c0, %c0_0, %c0_1] : memref<1x8x32xf32, #tpu.memory_space<vmem>>, vector<1x8x32xf32>
    %1 = vector.shape_cast %0 : vector<1x8x32xf32> to vector<8x32xf32>
    %c0_2 = arith.constant 0 : index
    %c0_3 = arith.constant 0 : index
    %2 = vector.load %arg2[%c0_2, %c0_3] : memref<1x32xf32, #tpu.memory_space<vmem>>, vector<1x32xf32>
    %c0_4 = arith.constant 0 : index
    %c0_5 = arith.constant 0 : index
    %3 = vector.load %arg3[%c0_4, %c0_5] : memref<1x32xf32, #tpu.memory_space<vmem>>, vector<1x32xf32>
    %cst = arith.constant dense<0.000000e+00> : vector<8xf32>
    %4 = vector.multi_reduction <add>, %1, %cst [1] : vector<8x32xf32> to vector<8xf32>
    %5 = vector.shape_cast %4 : vector<8xf32> to vector<8x1xf32>
    %cst_6 = arith.constant 3.200000e+01 : f32
    %6 = vector.broadcast %cst_6 : f32 to vector<8x1xf32>
    %7 = arith.divf %5, %6 : vector<8x1xf32>
    %8 = vector.broadcast %7 : vector<8x1xf32> to vector<8x32xf32>
    %9 = arith.subf %1, %8 : vector<8x32xf32>
    %10 = arith.mulf %9, %9 : vector<8x32xf32>
    %cst_7 = arith.constant dense<0.000000e+00> : vector<8xf32>
    %11 = vector.multi_reduction <add>, %10, %cst_7 [1] : vector<8x32xf32> to vector<8xf32>
    %12 = vector.shape_cast %11 : vector<8xf32> to vector<8x1xf32>
    %cst_8 = arith.constant 3.200000e+01 : f32
    %13 = vector.broadcast %cst_8 : f32 to vector<8x1xf32>
    %14 = arith.divf %12, %13 : vector<8x1xf32>
    %15 = vector.broadcast %7 : vector<8x1xf32> to vector<8x32xf32>
    %16 = arith.subf %1, %15 : vector<8x32xf32>
    %cst_9 = arith.constant 9.99999974E-6 : f32
    %17 = vector.broadcast %cst_9 : f32 to vector<8x1xf32>
    %18 = arith.addf %14, %17 : vector<8x1xf32>
    %19 = math.rsqrt %18 : vector<8x1xf32>
    %20 = vector.broadcast %19 : vector<8x1xf32> to vector<8x32xf32>
    %21 = arith.mulf %16, %20 : vector<8x32xf32>
    %22 = vector.broadcast %2 : vector<1x32xf32> to vector<8x32xf32>
    %23 = arith.mulf %21, %22 : vector<8x32xf32>
    %24 = vector.broadcast %3 : vector<1x32xf32> to vector<8x32xf32>
    %25 = arith.addf %23, %24 : vector<8x32xf32>
    %26 = arith.truncf %25 : vector<8x32xf32> to vector<8x32xbf16>
    %c0_10 = arith.constant 0 : index
    %c0_11 = arith.constant 0 : index
    %27 = vector.load %arg4[%c0_10, %c0_11] : memref<32x128xbf16, #tpu.memory_space<vmem>>, vector<32x128xbf16>
    %cst_12 = arith.constant dense<0.000000e+00> : vector<8x128xf32>
    %28 = tpu.matmul %26, %27, %cst_12 {dimension_numbers = #tpu.dot_dimension_numbers<[1], [0], [0], [1], [0, 0, 1, 1], [], []>} : vector<8x32xbf16>, vector<32x128xbf16>, vector<8x128xf32> -> vector<8x128xf32>
    %29 = vector.extract_strided_slice %28 {offsets = [0, 0], sizes = [8, 64], strides = [1, 1]} : vector<8x128xf32> to vector<8x64xf32>
    %30 = vector.extract_strided_slice %28 {offsets = [0, 64], sizes = [8, 64], strides = [1, 1]} : vector<8x128xf32> to vector<8x64xf32>
    %c0_13 = arith.constant 0 : index
    %c0_14 = arith.constant 0 : index
    %31 = vector.load %arg5[%c0_13, %c0_14] : memref<4x64xf32, #tpu.memory_space<vmem>>, vector<4x64xf32>
    %c0_15 = arith.constant 0 : index
    %c0_16 = arith.constant 0 : index
    %32 = vector.load %arg6[%c0_15, %c0_16] : memref<1x64xf32, #tpu.memory_space<vmem>>, vector<1x64xf32>
    %33 = vector.extract_strided_slice %31 {offsets = [3, 0], sizes = [1, 64], strides = [1, 1]} : vector<4x64xf32> to vector<1x64xf32>
    %34 = vector.broadcast %33 : vector<1x64xf32> to vector<8x64xf32>
    %35 = arith.mulf %29, %34 : vector<8x64xf32>
    %36 = vector.broadcast %32 : vector<1x64xf32> to vector<8x64xf32>
    %37 = arith.addf %36, %35 : vector<8x64xf32>
    %cst_17 = arith.constant 0.000000e+00 : f32
    %38 = vector.broadcast %cst_17 : f32 to vector<1x64xf32>
    %39 = vector.extract_strided_slice %29 {offsets = [0, 0], sizes = [7, 64], strides = [1, 1]} : vector<8x64xf32> to vector<7x64xf32>
    %40 = tpu.concatenate %38, %39 in 0 : vector<1x64xf32>, vector<7x64xf32> -> vector<8x64xf32>
    %41 = vector.extract_strided_slice %31 {offsets = [2, 0], sizes = [1, 64], strides = [1, 1]} : vector<4x64xf32> to vector<1x64xf32>
    %42 = vector.broadcast %41 : vector<1x64xf32> to vector<8x64xf32>
    %43 = arith.mulf %40, %42 : vector<8x64xf32>
    %44 = arith.addf %37, %43 : vector<8x64xf32>
    %45 = vector.extract_strided_slice %40 {offsets = [0, 0], sizes = [7, 64], strides = [1, 1]} : vector<8x64xf32> to vector<7x64xf32>
    %46 = tpu.concatenate %38, %45 in 0 : vector<1x64xf32>, vector<7x64xf32> -> vector<8x64xf32>
    %47 = vector.extract_strided_slice %31 {offsets = [1, 0], sizes = [1, 64], strides = [1, 1]} : vector<4x64xf32> to vector<1x64xf32>
    %48 = vector.broadcast %47 : vector<1x64xf32> to vector<8x64xf32>
    %49 = arith.mulf %46, %48 : vector<8x64xf32>
    %50 = arith.addf %44, %49 : vector<8x64xf32>
    %51 = vector.extract_strided_slice %46 {offsets = [0, 0], sizes = [7, 64], strides = [1, 1]} : vector<8x64xf32> to vector<7x64xf32>
    %52 = tpu.concatenate %38, %51 in 0 : vector<1x64xf32>, vector<7x64xf32> -> vector<8x64xf32>
    %53 = vector.extract_strided_slice %31 {offsets = [0, 0], sizes = [1, 64], strides = [1, 1]} : vector<4x64xf32> to vector<1x64xf32>
    %54 = vector.broadcast %53 : vector<1x64xf32> to vector<8x64xf32>
    %55 = arith.mulf %52, %54 : vector<8x64xf32>
    %56 = arith.addf %50, %55 : vector<8x64xf32>
    %57 = arith.negf %56 : vector<8x64xf32>
    %58 = math.exp %57 : vector<8x64xf32>
    %cst_18 = arith.constant 1.000000e+00 : f32
    %59 = vector.broadcast %cst_18 : f32 to vector<8x64xf32>
    %60 = arith.addf %59, %58 : vector<8x64xf32>
    %61 = arith.divf %59, %60 : vector<8x64xf32>
    %62 = arith.mulf %56, %61 : vector<8x64xf32>
    %63 = arith.truncf %62 : vector<8x64xf32> to vector<8x64xbf16>
    %c0_19 = arith.constant 0 : index
    %c0_20 = arith.constant 0 : index
    %64 = vector.load %arg7[%c0_19, %c0_20] : memref<64x96xbf16, #tpu.memory_space<vmem>>, vector<64x96xbf16>
    %cst_21 = arith.constant dense<0.000000e+00> : vector<8x96xf32>
    %65 = tpu.matmul %63, %64, %cst_21 {dimension_numbers = #tpu.dot_dimension_numbers<[1], [0], [0], [1], [0, 0, 1, 1], [], []>} : vector<8x64xbf16>, vector<64x96xbf16>, vector<8x96xf32> -> vector<8x96xf32>
    %66 = vector.extract_strided_slice %65 {offsets = [0, 0], sizes = [8, 64], strides = [1, 1]} : vector<8x96xf32> to vector<8x64xf32>
    %c0_22 = arith.constant 0 : index
    %c0_23 = arith.constant 0 : index
    %67 = vector.load %arg8[%c0_22, %c0_23] : memref<1x64xf32, #tpu.memory_space<vmem>>, vector<1x64xf32>
    %68 = vector.broadcast %67 : vector<1x64xf32> to vector<8x64xf32>
    %69 = arith.addf %66, %68 : vector<8x64xf32>
    %cst_24 = arith.constant 2.000000e+01 : f32
    %70 = vector.broadcast %cst_24 : f32 to vector<8x64xf32>
    %71 = arith.cmpf ogt, %69, %70 : vector<8x64xf32>
    %72 = math.exp %69 : vector<8x64xf32>
    %cst_25 = arith.constant 1.000000e+00 : f32
    %73 = vector.broadcast %cst_25 : f32 to vector<8x64xf32>
    %74 = arith.addf %73, %72 : vector<8x64xf32>
    %75 = math.log %74 : vector<8x64xf32>
    %76 = arith.select %71, %69, %75 : vector<8x64xi1>, vector<8x64xf32>
    %77 = vector.extract_strided_slice %65 {offsets = [0, 64], sizes = [8, 16], strides = [1, 1]} : vector<8x96xf32> to vector<8x16xf32>
    %78 = vector.extract_strided_slice %65 {offsets = [0, 80], sizes = [8, 16], strides = [1, 1]} : vector<8x96xf32> to vector<8x16xf32>
    %79 = arith.mulf %76, %62 : vector<8x64xf32>
    %c0_26 = arith.constant 0 : index
    %c0_27 = arith.constant 0 : index
    %80 = vector.load %arg9[%c0_26, %c0_27] : memref<16x64xf32, #tpu.memory_space<vmem>>, vector<16x64xf32>
    %c0_28 = arith.constant 0 : index
    %c0_29 = arith.constant 0 : index
    %81 = vector.load %arg12[%c0_28, %c0_29] : memref<1x32xf32, #tpu.memory_space<vmem>>, vector<1x32xf32>
    %c0_30 = arith.constant 0 : index
    %c0_31 = arith.constant 0 : index
    %82 = vector.load %arg13[%c0_30, %c0_31] : memref<1x32xf32, #tpu.memory_space<vmem>>, vector<1x32xf32>
    %c0_32 = arith.constant 0 : index
    %c0_33 = arith.constant 0 : index
    %83 = vector.load %arg14[%c0_32, %c0_33] : memref<1x32xf32, #tpu.memory_space<vmem>>, vector<1x32xf32>
    %c0_34 = arith.constant 0 : index
    %c0_35 = arith.constant 0 : index
    %84 = vector.load %arg15[%c0_34, %c0_35] : memref<1x32xf32, #tpu.memory_space<vmem>>, vector<1x32xf32>
    %c0_36 = arith.constant 0 : index
    %c0_37 = arith.constant 0 : index
    %85 = vector.load %arg17[%c0_36, %c0_37] : memref<1x128xf32, #tpu.memory_space<vmem>>, vector<1x128xf32>
    %c0_38 = arith.constant 0 : index
    %c0_39 = arith.constant 0 : index
    %86 = vector.load %arg19[%c0_38, %c0_39] : memref<1x32xf32, #tpu.memory_space<vmem>>, vector<1x32xf32>
    %c0_40 = arith.constant 0 : index
    %c0_41 = arith.constant 0 : index
    %87 = vector.load %arg10[%c0_40, %c0_41] : memref<1x64xf32, #tpu.memory_space<vmem>>, vector<1x64xf32>
    %cst_42 = arith.constant 0.000000e+00 : f32
    %88 = vector.broadcast %cst_42 : f32 to vector<16x64xf32>
    %89 = vector.shape_cast %76 : vector<8x64xf32> to vector<8x1x64xf32>
    %90 = vector.shape_cast %80 : vector<16x64xf32> to vector<1x16x64xf32>
    %91 = vector.broadcast %89 : vector<8x1x64xf32> to vector<8x16x64xf32>
    %92 = vector.broadcast %90 : vector<1x16x64xf32> to vector<8x16x64xf32>
    %93 = arith.mulf %91, %92 : vector<8x16x64xf32>
    %94 = math.exp %93 : vector<8x16x64xf32>
    %c0_43 = arith.constant 0 : index
    %c0_44 = arith.constant 0 : index
    %c0_45 = arith.constant 0 : index
    %95 = vector.load %arg21[%c0_43, %c0_44, %c0_45] : memref<8x16x64xf32, #tpu.memory_space<vmem>>, vector<8x16x64xf32>
    tpu.vector_store %arg21[%c0_43, %c0_44, %c0_45], %94 {strides = array<i32>} : memref<8x16x64xf32, #tpu.memory_space<vmem>>, vector<8x16x64xf32>,
    %96 = vector.shape_cast %77 : vector<8x16xf32> to vector<8x16x1xf32>
    %97 = vector.shape_cast %79 : vector<8x64xf32> to vector<8x1x64xf32>
    %98 = vector.broadcast %96 : vector<8x16x1xf32> to vector<8x16x64xf32>
    %99 = vector.broadcast %97 : vector<8x1x64xf32> to vector<8x16x64xf32>
    %100 = arith.mulf %98, %99 : vector<8x16x64xf32>
    %c0_46 = arith.constant 0 : index
    %c0_47 = arith.constant 0 : index
    %c0_48 = arith.constant 0 : index
    %101 = vector.load %arg22[%c0_46, %c0_47, %c0_48] : memref<8x16x64xf32, #tpu.memory_space<vmem>>, vector<8x16x64xf32>
    tpu.vector_store %arg22[%c0_46, %c0_47, %c0_48], %100 {strides = array<i32>} : memref<8x16x64xf32, #tpu.memory_space<vmem>>, vector<8x16x64xf32>,
    %c0_i32 = arith.constant 0 : i32
    %102 = arith.index_cast %c0_i32 : i32 to index
    %c0_49 = arith.constant 0 : index
    %c0_50 = arith.constant 0 : index
    %103 = vector.load %arg21[%102, %c0_49, %c0_50] : memref<8x16x64xf32, #tpu.memory_space<vmem>>, vector<1x16x64xf32>
    %104 = vector.shape_cast %103 : vector<1x16x64xf32> to vector<16x64xf32>
    %105 = arith.mulf %104, %88 : vector<16x64xf32>
    %106 = arith.index_cast %c0_i32 : i32 to index
    %c0_51 = arith.constant 0 : index
    %c0_52 = arith.constant 0 : index
    %107 = vector.load %arg22[%106, %c0_51, %c0_52] : memref<8x16x64xf32, #tpu.memory_space<vmem>>, vector<1x16x64xf32>
    %108 = vector.shape_cast %107 : vector<1x16x64xf32> to vector<16x64xf32>
    %109 = arith.addf %105, %108 : vector<16x64xf32>
    %110 = arith.index_cast %c0_i32 : i32 to index
    %c0_53 = arith.constant 0 : index
    %c0_54 = arith.constant 0 : index
    %111 = vector.load %arg21[%110, %c0_53, %c0_54] : memref<8x16x64xf32, #tpu.memory_space<vmem>>, vector<1x16x64xf32>
    %112 = vector.shape_cast %111 : vector<1x16x64xf32> to vector<16x64xf32>
    %113 = vector.shape_cast %109 : vector<16x64xf32> to vector<1x16x64xf32>
    tpu.vector_store %arg21[%110, %c0_53, %c0_54], %113 {strides = array<i32>} : memref<8x16x64xf32, #tpu.memory_space<vmem>>, vector<1x16x64xf32>,
    %c1_i32 = arith.constant 1 : i32
    %114 = arith.index_cast %c1_i32 : i32 to index
    %c0_55 = arith.constant 0 : index
    %c0_56 = arith.constant 0 : index
    %115 = vector.load %arg21[%114, %c0_55, %c0_56] : memref<8x16x64xf32, #tpu.memory_space<vmem>>, vector<1x16x64xf32>
    %116 = vector.shape_cast %115 : vector<1x16x64xf32> to vector<16x64xf32>
    %117 = arith.mulf %116, %109 : vector<16x64xf32>
    %118 = arith.index_cast %c1_i32 : i32 to index
    %c0_57 = arith.constant 0 : index
    %c0_58 = arith.constant 0 : index
    %119 = vector.load %arg22[%118, %c0_57, %c0_58] : memref<8x16x64xf32, #tpu.memory_space<vmem>>, vector<1x16x64xf32>
    %120 = vector.shape_cast %119 : vector<1x16x64xf32> to vector<16x64xf32>
    %121 = arith.addf %117, %120 : vector<16x64xf32>
    %122 = arith.index_cast %c1_i32 : i32 to index
    %c0_59 = arith.constant 0 : index
    %c0_60 = arith.constant 0 : index
    %123 = vector.load %arg21[%122, %c0_59, %c0_60] : memref<8x16x64xf32, #tpu.memory_space<vmem>>, vector<1x16x64xf32>
    %124 = vector.shape_cast %123 : vector<1x16x64xf32> to vector<16x64xf32>
    %125 = vector.shape_cast %121 : vector<16x64xf32> to vector<1x16x64xf32>
    tpu.vector_store %arg21[%122, %c0_59, %c0_60], %125 {strides = array<i32>} : memref<8x16x64xf32, #tpu.memory_space<vmem>>, vector<1x16x64xf32>,
    %c2_i32 = arith.constant 2 : i32
    %126 = arith.index_cast %c2_i32 : i32 to index
    %c0_61 = arith.constant 0 : index
    %c0_62 = arith.constant 0 : index
    %127 = vector.load %arg21[%126, %c0_61, %c0_62] : memref<8x16x64xf32, #tpu.memory_space<vmem>>, vector<1x16x64xf32>
    %128 = vector.shape_cast %127 : vector<1x16x64xf32> to vector<16x64xf32>
    %129 = arith.mulf %128, %121 : vector<16x64xf32>
    %130 = arith.index_cast %c2_i32 : i32 to index
    %c0_63 = arith.constant 0 : index
    %c0_64 = arith.constant 0 : index
    %131 = vector.load %arg22[%130, %c0_63, %c0_64] : memref<8x16x64xf32, #tpu.memory_space<vmem>>, vector<1x16x64xf32>
    %132 = vector.shape_cast %131 : vector<1x16x64xf32> to vector<16x64xf32>
    %133 = arith.addf %129, %132 : vector<16x64xf32>
    %134 = arith.index_cast %c2_i32 : i32 to index
    %c0_65 = arith.constant 0 : index
    %c0_66 = arith.constant 0 : index
    %135 = vector.load %arg21[%134, %c0_65, %c0_66] : memref<8x16x64xf32, #tpu.memory_space<vmem>>, vector<1x16x64xf32>
    %136 = vector.shape_cast %135 : vector<1x16x64xf32> to vector<16x64xf32>
    %137 = vector.shape_cast %133 : vector<16x64xf32> to vector<1x16x64xf32>
    tpu.vector_store %arg21[%134, %c0_65, %c0_66], %137 {strides = array<i32>} : memref<8x16x64xf32, #tpu.memory_space<vmem>>, vector<1x16x64xf32>,
    %c3_i32 = arith.constant 3 : i32
    %138 = arith.index_cast %c3_i32 : i32 to index
    %c0_67 = arith.constant 0 : index
    %c0_68 = arith.constant 0 : index
    %139 = vector.load %arg21[%138, %c0_67, %c0_68] : memref<8x16x64xf32, #tpu.memory_space<vmem>>, vector<1x16x64xf32>
    %140 = vector.shape_cast %139 : vector<1x16x64xf32> to vector<16x64xf32>
    %141 = arith.mulf %140, %133 : vector<16x64xf32>
    %142 = arith.index_cast %c3_i32 : i32 to index
    %c0_69 = arith.constant 0 : index
    %c0_70 = arith.constant 0 : index
    %143 = vector.load %arg22[%142, %c0_69, %c0_70] : memref<8x16x64xf32, #tpu.memory_space<vmem>>, vector<1x16x64xf32>
    %144 = vector.shape_cast %143 : vector<1x16x64xf32> to vector<16x64xf32>
    %145 = arith.addf %141, %144 : vector<16x64xf32>
    %146 = arith.index_cast %c3_i32 : i32 to index
    %c0_71 = arith.constant 0 : index
    %c0_72 = arith.constant 0 : index
    %147 = vector.load %arg21[%146, %c0_71, %c0_72] : memref<8x16x64xf32, #tpu.memory_space<vmem>>, vector<1x16x64xf32>
    %148 = vector.shape_cast %147 : vector<1x16x64xf32> to vector<16x64xf32>
    %149 = vector.shape_cast %145 : vector<16x64xf32> to vector<1x16x64xf32>
    tpu.vector_store %arg21[%146, %c0_71, %c0_72], %149 {strides = array<i32>} : memref<8x16x64xf32, #tpu.memory_space<vmem>>, vector<1x16x64xf32>,
    %c4_i32 = arith.constant 4 : i32
    %150 = arith.index_cast %c4_i32 : i32 to index
    %c0_73 = arith.constant 0 : index
    %c0_74 = arith.constant 0 : index
    %151 = vector.load %arg21[%150, %c0_73, %c0_74] : memref<8x16x64xf32, #tpu.memory_space<vmem>>, vector<1x16x64xf32>
    %152 = vector.shape_cast %151 : vector<1x16x64xf32> to vector<16x64xf32>
    %153 = arith.mulf %152, %145 : vector<16x64xf32>
    %154 = arith.index_cast %c4_i32 : i32 to index
    %c0_75 = arith.constant 0 : index
    %c0_76 = arith.constant 0 : index
    %155 = vector.load %arg22[%154, %c0_75, %c0_76] : memref<8x16x64xf32, #tpu.memory_space<vmem>>, vector<1x16x64xf32>
    %156 = vector.shape_cast %155 : vector<1x16x64xf32> to vector<16x64xf32>
    %157 = arith.addf %153, %156 : vector<16x64xf32>
    %158 = arith.index_cast %c4_i32 : i32 to index
    %c0_77 = arith.constant 0 : index
    %c0_78 = arith.constant 0 : index
    %159 = vector.load %arg21[%158, %c0_77, %c0_78] : memref<8x16x64xf32, #tpu.memory_space<vmem>>, vector<1x16x64xf32>
    %160 = vector.shape_cast %159 : vector<1x16x64xf32> to vector<16x64xf32>
    %161 = vector.shape_cast %157 : vector<16x64xf32> to vector<1x16x64xf32>
    tpu.vector_store %arg21[%158, %c0_77, %c0_78], %161 {strides = array<i32>} : memref<8x16x64xf32, #tpu.memory_space<vmem>>, vector<1x16x64xf32>,
    %c5_i32 = arith.constant 5 : i32
    %162 = arith.index_cast %c5_i32 : i32 to index
    %c0_79 = arith.constant 0 : index
    %c0_80 = arith.constant 0 : index
    %163 = vector.load %arg21[%162, %c0_79, %c0_80] : memref<8x16x64xf32, #tpu.memory_space<vmem>>, vector<1x16x64xf32>
    %164 = vector.shape_cast %163 : vector<1x16x64xf32> to vector<16x64xf32>
    %165 = arith.mulf %164, %157 : vector<16x64xf32>
    %166 = arith.index_cast %c5_i32 : i32 to index
    %c0_81 = arith.constant 0 : index
    %c0_82 = arith.constant 0 : index
    %167 = vector.load %arg22[%166, %c0_81, %c0_82] : memref<8x16x64xf32, #tpu.memory_space<vmem>>, vector<1x16x64xf32>
    %168 = vector.shape_cast %167 : vector<1x16x64xf32> to vector<16x64xf32>
    %169 = arith.addf %165, %168 : vector<16x64xf32>
    %170 = arith.index_cast %c5_i32 : i32 to index
    %c0_83 = arith.constant 0 : index
    %c0_84 = arith.constant 0 : index
    %171 = vector.load %arg21[%170, %c0_83, %c0_84] : memref<8x16x64xf32, #tpu.memory_space<vmem>>, vector<1x16x64xf32>
    %172 = vector.shape_cast %171 : vector<1x16x64xf32> to vector<16x64xf32>
    %173 = vector.shape_cast %169 : vector<16x64xf32> to vector<1x16x64xf32>
    tpu.vector_store %arg21[%170, %c0_83, %c0_84], %173 {strides = array<i32>} : memref<8x16x64xf32, #tpu.memory_space<vmem>>, vector<1x16x64xf32>,
    %c6_i32 = arith.constant 6 : i32
    %174 = arith.index_cast %c6_i32 : i32 to index
    %c0_85 = arith.constant 0 : index
    %c0_86 = arith.constant 0 : index
    %175 = vector.load %arg21[%174, %c0_85, %c0_86] : memref<8x16x64xf32, #tpu.memory_space<vmem>>, vector<1x16x64xf32>
    %176 = vector.shape_cast %175 : vector<1x16x64xf32> to vector<16x64xf32>
    %177 = arith.mulf %176, %169 : vector<16x64xf32>
    %178 = arith.index_cast %c6_i32 : i32 to index
    %c0_87 = arith.constant 0 : index
    %c0_88 = arith.constant 0 : index
    %179 = vector.load %arg22[%178, %c0_87, %c0_88] : memref<8x16x64xf32, #tpu.memory_space<vmem>>, vector<1x16x64xf32>
    %180 = vector.shape_cast %179 : vector<1x16x64xf32> to vector<16x64xf32>
    %181 = arith.addf %177, %180 : vector<16x64xf32>
    %182 = arith.index_cast %c6_i32 : i32 to index
    %c0_89 = arith.constant 0 : index
    %c0_90 = arith.constant 0 : index
    %183 = vector.load %arg21[%182, %c0_89, %c0_90] : memref<8x16x64xf32, #tpu.memory_space<vmem>>, vector<1x16x64xf32>
    %184 = vector.shape_cast %183 : vector<1x16x64xf32> to vector<16x64xf32>
    %185 = vector.shape_cast %181 : vector<16x64xf32> to vector<1x16x64xf32>
    tpu.vector_store %arg21[%182, %c0_89, %c0_90], %185 {strides = array<i32>} : memref<8x16x64xf32, #tpu.memory_space<vmem>>, vector<1x16x64xf32>,
    %c7_i32 = arith.constant 7 : i32
    %186 = arith.index_cast %c7_i32 : i32 to index
    %c0_91 = arith.constant 0 : index
    %c0_92 = arith.constant 0 : index
    %187 = vector.load %arg21[%186, %c0_91, %c0_92] : memref<8x16x64xf32, #tpu.memory_space<vmem>>, vector<1x16x64xf32>
    %188 = vector.shape_cast %187 : vector<1x16x64xf32> to vector<16x64xf32>
    %189 = arith.mulf %188, %181 : vector<16x64xf32>
    %190 = arith.index_cast %c7_i32 : i32 to index
    %c0_93 = arith.constant 0 : index
    %c0_94 = arith.constant 0 : index
    %191 = vector.load %arg22[%190, %c0_93, %c0_94] : memref<8x16x64xf32, #tpu.memory_space<vmem>>, vector<1x16x64xf32>
    %192 = vector.shape_cast %191 : vector<1x16x64xf32> to vector<16x64xf32>
    %193 = arith.addf %189, %192 : vector<16x64xf32>
    %194 = arith.index_cast %c7_i32 : i32 to index
    %c0_95 = arith.constant 0 : index
    %c0_96 = arith.constant 0 : index
    %195 = vector.load %arg21[%194, %c0_95, %c0_96] : memref<8x16x64xf32, #tpu.memory_space<vmem>>, vector<1x16x64xf32>
    %196 = vector.shape_cast %195 : vector<1x16x64xf32> to vector<16x64xf32>
    %197 = vector.shape_cast %193 : vector<16x64xf32> to vector<1x16x64xf32>
    tpu.vector_store %arg21[%194, %c0_95, %c0_96], %197 {strides = array<i32>} : memref<8x16x64xf32, #tpu.memory_space<vmem>>, vector<1x16x64xf32>,
    %c8_i32 = arith.constant 8 : i32
    %c0_97 = arith.constant 0 : index
    %c0_98 = arith.constant 0 : index
    %c0_99 = arith.constant 0 : index
    %198 = vector.load %arg21[%c0_97, %c0_98, %c0_99] : memref<8x16x64xf32, #tpu.memory_space<vmem>>, vector<8x16x64xf32>
    %199 = vector.shape_cast %78 : vector<8x16xf32> to vector<8x16x1xf32>
    %200 = vector.broadcast %199 : vector<8x16x1xf32> to vector<8x16x64xf32>
    %201 = arith.mulf %200, %198 : vector<8x16x64xf32>
    %cst_100 = arith.constant dense<0.000000e+00> : vector<8x64xf32>
    %202 = vector.multi_reduction <add>, %201, %cst_100 [1] : vector<8x16x64xf32> to vector<8x64xf32>
    %203 = vector.broadcast %87 : vector<1x64xf32> to vector<8x64xf32>
    %204 = arith.mulf %62, %203 : vector<8x64xf32>
    %205 = arith.addf %202, %204 : vector<8x64xf32>
    %206 = arith.negf %30 : vector<8x64xf32>
    %207 = math.exp %206 : vector<8x64xf32>
    %cst_101 = arith.constant 1.000000e+00 : f32
    %208 = vector.broadcast %cst_101 : f32 to vector<8x64xf32>
    %209 = arith.addf %208, %207 : vector<8x64xf32>
    %210 = arith.divf %208, %209 : vector<8x64xf32>
    %211 = arith.mulf %30, %210 : vector<8x64xf32>
    %212 = arith.mulf %205, %211 : vector<8x64xf32>
    %213 = arith.truncf %212 : vector<8x64xf32> to vector<8x64xbf16>
    %c0_102 = arith.constant 0 : index
    %c0_103 = arith.constant 0 : index
    %214 = vector.load %arg11[%c0_102, %c0_103] : memref<64x32xbf16, #tpu.memory_space<vmem>>, vector<64x32xbf16>
    %cst_104 = arith.constant dense<0.000000e+00> : vector<8x32xf32>
    %215 = tpu.matmul %213, %214, %cst_104 {dimension_numbers = #tpu.dot_dimension_numbers<[1], [0], [0], [1], [0, 0, 1, 1], [], []>} : vector<8x64xbf16>, vector<64x32xbf16>, vector<8x32xf32> -> vector<8x32xf32>
    %216 = arith.addf %1, %215 : vector<8x32xf32>
    %cst_105 = arith.constant dense<0.000000e+00> : vector<8xf32>
    %217 = vector.multi_reduction <add>, %216, %cst_105 [1] : vector<8x32xf32> to vector<8xf32>
    %218 = vector.shape_cast %217 : vector<8xf32> to vector<8x1xf32>
    %cst_106 = arith.constant 3.200000e+01 : f32
    %219 = vector.broadcast %cst_106 : f32 to vector<8x1xf32>
    %220 = arith.divf %218, %219 : vector<8x1xf32>
    %221 = vector.broadcast %220 : vector<8x1xf32> to vector<8x32xf32>
    %222 = arith.subf %216, %221 : vector<8x32xf32>
    %223 = arith.mulf %222, %222 : vector<8x32xf32>
    %cst_107 = arith.constant dense<0.000000e+00> : vector<8xf32>
    %224 = vector.multi_reduction <add>, %223, %cst_107 [1] : vector<8x32xf32> to vector<8xf32>
    %225 = vector.shape_cast %224 : vector<8xf32> to vector<8x1xf32>
    %cst_108 = arith.constant 3.200000e+01 : f32
    %226 = vector.broadcast %cst_108 : f32 to vector<8x1xf32>
    %227 = arith.divf %225, %226 : vector<8x1xf32>
    %228 = vector.broadcast %220 : vector<8x1xf32> to vector<8x32xf32>
    %229 = arith.subf %216, %228 : vector<8x32xf32>
    %cst_109 = arith.constant 9.99999974E-6 : f32
    %230 = vector.broadcast %cst_109 : f32 to vector<8x1xf32>
    %231 = arith.addf %227, %230 : vector<8x1xf32>
    %232 = math.rsqrt %231 : vector<8x1xf32>
    %233 = vector.broadcast %232 : vector<8x1xf32> to vector<8x32xf32>
    %234 = arith.mulf %229, %233 : vector<8x32xf32>
    %235 = vector.broadcast %81 : vector<1x32xf32> to vector<8x32xf32>
    %236 = arith.mulf %234, %235 : vector<8x32xf32>
    %237 = vector.broadcast %82 : vector<1x32xf32> to vector<8x32xf32>
    %238 = arith.addf %236, %237 : vector<8x32xf32>
    %239 = arith.truncf %238 : vector<8x32xf32> to vector<8x32xbf16>
    %c0_110 = arith.constant 0 : index
    %c0_111 = arith.constant 0 : index
    %240 = vector.load %arg16[%c0_110, %c0_111] : memref<32x128xbf16, #tpu.memory_space<vmem>>, vector<32x128xbf16>
    %cst_112 = arith.constant dense<0.000000e+00> : vector<8x128xf32>
    %241 = tpu.matmul %239, %240, %cst_112 {dimension_numbers = #tpu.dot_dimension_numbers<[1], [0], [0], [1], [0, 0, 1, 1], [], []>} : vector<8x32xbf16>, vector<32x128xbf16>, vector<8x128xf32> -> vector<8x128xf32>
    %242 = vector.broadcast %85 : vector<1x128xf32> to vector<8x128xf32>
    %243 = arith.addf %241, %242 : vector<8x128xf32>
    %cst_113 = arith.constant 5.000000e-01 : f32
    %244 = vector.broadcast %cst_113 : f32 to vector<8x128xf32>
    %245 = arith.mulf %244, %243 : vector<8x128xf32>
    %cst_114 = arith.constant 4.471500e-02 : f32
    %246 = vector.broadcast %cst_114 : f32 to vector<8x128xf32>
    %247 = arith.mulf %246, %243 : vector<8x128xf32>
    %248 = arith.mulf %247, %243 : vector<8x128xf32>
    %249 = arith.mulf %248, %243 : vector<8x128xf32>
    %250 = arith.addf %243, %249 : vector<8x128xf32>
    %cst_115 = arith.constant 0.797884583 : f32
    %251 = vector.broadcast %cst_115 : f32 to vector<8x128xf32>
    %252 = arith.mulf %251, %250 : vector<8x128xf32>
    %253 = math.tanh %252 : vector<8x128xf32>
    %cst_116 = arith.constant 1.000000e+00 : f32
    %254 = vector.broadcast %cst_116 : f32 to vector<8x128xf32>
    %255 = arith.addf %254, %253 : vector<8x128xf32>
    %256 = arith.mulf %245, %255 : vector<8x128xf32>
    %257 = arith.truncf %256 : vector<8x128xf32> to vector<8x128xbf16>
    %c0_117 = arith.constant 0 : index
    %c0_118 = arith.constant 0 : index
    %258 = vector.load %arg18[%c0_117, %c0_118] : memref<128x32xbf16, #tpu.memory_space<vmem>>, vector<128x32xbf16>
    %cst_119 = arith.constant dense<0.000000e+00> : vector<8x32xf32>
    %259 = tpu.matmul %257, %258, %cst_119 {dimension_numbers = #tpu.dot_dimension_numbers<[1], [0], [0], [1], [0, 0, 1, 1], [], []>} : vector<8x128xbf16>, vector<128x32xbf16>, vector<8x32xf32> -> vector<8x32xf32>
    %260 = vector.broadcast %86 : vector<1x32xf32> to vector<8x32xf32>
    %261 = arith.addf %259, %260 : vector<8x32xf32>
    %262 = arith.addf %216, %261 : vector<8x32xf32>
    %cst_120 = arith.constant dense<0.000000e+00> : vector<8xf32>
    %263 = vector.multi_reduction <add>, %262, %cst_120 [1] : vector<8x32xf32> to vector<8xf32>
    %264 = vector.shape_cast %263 : vector<8xf32> to vector<8x1xf32>
    %cst_121 = arith.constant 3.200000e+01 : f32
    %265 = vector.broadcast %cst_121 : f32 to vector<8x1xf32>
    %266 = arith.divf %264, %265 : vector<8x1xf32>
    %267 = vector.broadcast %266 : vector<8x1xf32> to vector<8x32xf32>
    %268 = arith.subf %262, %267 : vector<8x32xf32>
    %269 = arith.mulf %268, %268 : vector<8x32xf32>
    %cst_122 = arith.constant dense<0.000000e+00> : vector<8xf32>
    %270 = vector.multi_reduction <add>, %269, %cst_122 [1] : vector<8x32xf32> to vector<8xf32>
    %271 = vector.shape_cast %270 : vector<8xf32> to vector<8x1xf32>
    %cst_123 = arith.constant 3.200000e+01 : f32
    %272 = vector.broadcast %cst_123 : f32 to vector<8x1xf32>
    %273 = arith.divf %271, %272 : vector<8x1xf32>
    %274 = vector.broadcast %266 : vector<8x1xf32> to vector<8x32xf32>
    %275 = arith.subf %262, %274 : vector<8x32xf32>
    %cst_124 = arith.constant 9.99999974E-6 : f32
    %276 = vector.broadcast %cst_124 : f32 to vector<8x1xf32>
    %277 = arith.addf %273, %276 : vector<8x1xf32>
    %278 = math.rsqrt %277 : vector<8x1xf32>
    %279 = vector.broadcast %278 : vector<8x1xf32> to vector<8x32xf32>
    %280 = arith.mulf %275, %279 : vector<8x32xf32>
    %281 = vector.broadcast %83 : vector<1x32xf32> to vector<8x32xf32>
    %282 = arith.mulf %280, %281 : vector<8x32xf32>
    %283 = vector.broadcast %84 : vector<1x32xf32> to vector<8x32xf32>
    %284 = arith.addf %282, %283 : vector<8x32xf32>
    %c0_125 = arith.constant 0 : index
    %c0_126 = arith.constant 0 : index
    %c0_127 = arith.constant 0 : index
    %285 = vector.load %arg20[%c0_125, %c0_126, %c0_127] : memref<1x8x32xf32, #tpu.memory_space<vmem>>, vector<1x8x32xf32>
    %286 = vector.shape_cast %285 : vector<1x8x32xf32> to vector<8x32xf32>
    %287 = vector.shape_cast %284 : vector<8x32xf32> to vector<1x8x32xf32>
    tpu.vector_store %arg20[%c0_125, %c0_126, %c0_127], %287 {strides = array<i32>} : memref<1x8x32xf32, #tpu.memory_space<vmem>>, vector<1x8x32xf32>,
    return
  }
  func.func @transform_0(%arg0: i32) -> (i32, i32, i32) {
    %c0_i32 = arith.constant 0 : i32
    %c0_i32_0 = arith.constant 0 : i32
    %c0_i32_1 = arith.constant 0 : i32
    return %arg0, %c0_i32, %c0_i32_0 : i32, i32, i32
  }
  func.func @transform_1(%arg0: i32) -> (i32, i32) {
    %c0_i32 = arith.constant 0 : i32
    %c0_i32_0 = arith.constant 0 : i32
    %c0_i32_1 = arith.constant 0 : i32
    return %c0_i32, %c0_i32_0 : i32, i32
  }
  func.func @transform_2(%arg0: i32) -> (i32, i32) {
    %c0_i32 = arith.constant 0 : i32
    %c0_i32_0 = arith.constant 0 : i32
    %c0_i32_1 = arith.constant 0 : i32
    return %c0_i32, %c0_i32_0 : i32, i32
  }
  func.func @transform_3(%arg0: i32) -> (i32, i32) {
    %c0_i32 = arith.constant 0 : i32
    %c0_i32_0 = arith.constant 0 : i32
    %c0_i32_1 = arith.constant 0 : i32
    return %c0_i32, %c0_i32_0 : i32, i32
  }
  func.func @transform_4(%arg0: i32) -> (i32, i32) {
    %c0_i32 = arith.constant 0 : i32
    %c0_i32_0 = arith.constant 0 : i32
    %c0_i32_1 = arith.constant 0 : i32
    return %c0_i32, %c0_i32_0 : i32, i32
  }
  func.func @transform_5(%arg0: i32) -> (i32, i32) {
    %c0_i32 = arith.constant 0 : i32
    %c0_i32_0 = arith.constant 0 : i32
    %c0_i32_1 = arith.constant 0 : i32
    return %c0_i32, %c0_i32_0 : i32, i32
  }
  func.func @transform_6(%arg0: i32) -> (i32, i32) {
    %c0_i32 = arith.constant 0 : i32
    %c0_i32_0 = arith.constant 0 : i32
    %c0_i32_1 = arith.constant 0 : i32
    return %c0_i32, %c0_i32_0 : i32, i32
  }
  func.func @transform_7(%arg0: i32) -> (i32, i32) {
    %c0_i32 = arith.constant 0 : i32
    %c0_i32_0 = arith.constant 0 : i32
    %c0_i32_1 = arith.constant 0 : i32
    return %c0_i32, %c0_i32_0 : i32, i32
  }
  func.func @transform_8(%arg0: i32) -> (i32, i32) {
    %c0_i32 = arith.constant 0 : i32
    %c0_i32_0 = arith.constant 0 : i32
    %c0_i32_1 = arith.constant 0 : i32
    return %c0_i32, %c0_i32_0 : i32, i32
  }
  func.func @transform_9(%arg0: i32) -> (i32, i32) {
    %c0_i32 = arith.constant 0 : i32
    %c0_i32_0 = arith.constant 0 : i32
    %c0_i32_1 = arith.constant 0 : i32
    return %c0_i32, %c0_i32_0 : i32, i32
  }
  func.func @transform_10(%arg0: i32) -> (i32, i32) {
    %c0_i32 = arith.constant 0 : i32
    %c0_i32_0 = arith.constant 0 : i32
    %c0_i32_1 = arith.constant 0 : i32
    return %c0_i32, %c0_i32_0 : i32, i32
  }
  func.func @transform_11(%arg0: i32) -> (i32, i32) {
    %c0_i32 = arith.constant 0 : i32
    %c0_i32_0 = arith.constant 0 : i32
    %c0_i32_1 = arith.constant 0 : i32
    return %c0_i32, %c0_i32_0 : i32, i32
  }
  func.func @transform_12(%arg0: i32) -> (i32, i32) {
    %c0_i32 = arith.constant 0 : i32
    %c0_i32_0 = arith.constant 0 : i32
    %c0_i32_1 = arith.constant 0 : i32
    return %c0_i32, %c0_i32_0 : i32, i32
  }
  func.func @transform_13(%arg0: i32) -> (i32, i32) {
    %c0_i32 = arith.constant 0 : i32
    %c0_i32_0 = arith.constant 0 : i32
    %c0_i32_1 = arith.constant 0 : i32
    return %c0_i32, %c0_i32_0 : i32, i32
  }
  func.func @transform_14(%arg0: i32) -> (i32, i32) {
    %c0_i32 = arith.constant 0 : i32
    %c0_i32_0 = arith.constant 0 : i32
    %c0_i32_1 = arith.constant 0 : i32
    return %c0_i32, %c0_i32_0 : i32, i32
  }
  func.func @transform_15(%arg0: i32) -> (i32, i32) {
    %c0_i32 = arith.constant 0 : i32
    %c0_i32_0 = arith.constant 0 : i32
    %c0_i32_1 = arith.constant 0 : i32
    return %c0_i32, %c0_i32_0 : i32, i32
  }
  func.func @transform_16(%arg0: i32) -> (i32, i32) {
    %c0_i32 = arith.constant 0 : i32
    %c0_i32_0 = arith.constant 0 : i32
    %c0_i32_1 = arith.constant 0 : i32
    return %c0_i32, %c0_i32_0 : i32, i32
  }
  func.func @transform_17(%arg0: i32) -> (i32, i32) {
    %c0_i32 = arith.constant 0 : i32
    %c0_i32_0 = arith.constant 0 : i32
    %c0_i32_1 = arith.constant 0 : i32
    return %c0_i32, %c0_i32_0 : i32, i32
  }
  func.func @transform_18(%arg0: i32) -> (i32, i32) {
    %c0_i32 = arith.constant 0 : i32
    %c0_i32_0 = arith.constant 0 : i32
    %c0_i32_1 = arith.constant 0 : i32
    return %c0_i32, %c0_i32_0 : i32, i32
  }
  func.func @transform_19(%arg0: i32) -> (i32, i32, i32) {
    %c0_i32 = arith.constant 0 : i32
    %c0_i32_0 = arith.constant 0 : i32
    %c0_i32_1 = arith.constant 0 : i32
    return %arg0, %c0_i32, %c0_i32_0 : i32, i32, i32
  }
}

</mosaic_0001>

<bundles_post_ra>
// kernel: tpu_custom_call.1
= control target key start
LH: loop header
LB: loop body
LE: loop exit
PB: predicated region body
PF: predicated region fallthrough
CT: control target
= control target key end

     0   :  { %s2908_s0 = inlined_call_operand.vmem [shape: f32[2,8,32], index: 0, kind: input, shape index: {}]   ;;  %s2909_s1 = inlined_call_operand.vmem [shape: f32[1,32], index: 1, kind: input, shape index: {}]   ;;  %s2910_s2 = inlined_call_operand.vmem [shape: f32[1,32], index: 2, kind: input, shape index: {}]   ;;  %s2911_s3 = inlined_call_operand.vmem [shape: bf16[32,128], index: 3, kind: input, shape index: {}]   ;;  %s2912_s4 = inlined_call_operand.vmem [shape: f32[4,64], index: 4, kind: input, shape index: {}]   ;;  %s2913_s5 = inlined_call_operand.vmem [shape: f32[1,64], index: 5, kind: input, shape index: {}]   ;;  %s2914_s6 = inlined_call_operand.vmem [shape: bf16[64,96], index: 6, kind: input, shape index: {}]   ;;  %s2915_s7 = inlined_call_operand.vmem [shape: f32[1,64], index: 7, kind: input, shape index: {}]   ;;  %s2916_s8 = inlined_call_operand.vmem [shape: f32[16,64], index: 8, kind: input, shape index: {}]   ;;  %s2917_s9 = inlined_call_operand.vmem [shape: f32[1,64], index: 9, kind: input, shape index: {}]   ;;  %s2918_s10 = inlined_call_operand.vmem [shape: bf16[64,32], index: 10, kind: input, shape index: {}]   ;;  %s2919_s11 = inlined_call_operand.vmem [shape: f32[1,32], index: 11, kind: input, shape index: {}]   ;;  %s2920_s12 = inlined_call_operand.vmem [shape: f32[1,32], index: 12, kind: input, shape index: {}]   ;;  %s2921_s13 = inlined_call_operand.vmem [shape: f32[1,32], index: 13, kind: input, shape index: {}]   ;;  %s2922_s14 = inlined_call_operand.vmem [shape: f32[1,32], index: 14, kind: input, shape index: {}]   ;;  %s2923_s15 = inlined_call_operand.vmem [shape: bf16[32,128], index: 15, kind: input, shape index: {}]   ;;  %s2924_s16 = inlined_call_operand.vmem [shape: f32[1,128], index: 16, kind: input, shape index: {}]   ;;  %s2925_s17 = inlined_call_operand.vmem [shape: bf16[128,32], index: 17, kind: input, shape index: {}]   ;;  %s2926_s18 = inlined_call_operand.vmem [shape: f32[1,32], index: 18, kind: input, shape index: {}]   ;;  %s2927_s19 = inlined_call_operand.hbm [shape: f32[2,8,32], index: 19, kind: output, shape index: {}]  }
   0x1   :  { %2933 = sst [smem:[#allocation10_spill]] %s2908_s0 }
   0x2   :  { %2934 = sst [smem:[#allocation11_spill]] %s2909_s1 }
   0x3   :  { %2935 = sst [smem:[#allocation12_spill]] %s2910_s2 }
   0x4   :  { %2936 = sst [smem:[#allocation13_spill]] %s2911_s3 }
   0x5   :  { %2937 = sst [smem:[#allocation14_spill]] %s2912_s4 }
   0x6   :  { %2938 = sst [smem:[#allocation15_spill]] %s2913_s5 }
   0x7   :  { %2939 = sst [smem:[#allocation16_spill]] %s2914_s6 }
   0x8   :  { %24 = vsyncpa [#allocation5], 0 }
   0x9   :  { %26 = vsyncpa [#allocation5 + $0x1], 0  ;;  %s2411_s0 = smov 0   ;;  %s2413_s30 = smov 0  }
   0xa   :  { %s2415_s20 = smov 0   ;;  %s2417_s21 = smov 0  }
   0xb LB: > { %2940 = sst [smem:[#allocation7_spill]] %s2300_s20  ;;  %s2432_s1 = sadd.s32 4294967295, %s2304_s21   ;;  %s2304_s21 = sphi %s2417_s21, %s2953_s21   ;;  %s2300_s20 = sphi %s2415_s20, %s2955_s20   ;;  %s2296_s30 = sphi %s2413_s30, %s2957_s30   ;;  %s2292_s0 = sphi %s2411_s0, %s2956_s0  }
   0xc   : > { %s1994_s22 = sadd.s32 4294967294, %s2304_s21   ;;  %s2436_s2 = sadd.s32 1, %s2304_s21  }
   0xd   : > { %2941 = sst [smem:[#allocation8_spill]] %s2436_s2  ;;  %s443_s23 = sadd.s32 1, %s2300_s20 }
   0xe   : > { %s440_s24 = ssub.s32 %s2304_s21, %s2436_s2  ;;  %p453_p0 = scmp.ne.s32.totalorder %s2300_s20, %s2296_s30 }
   0xf   : > { %p441_p1 = scmp.eq.s32.totalorder %s440_s24, 0  ;;  %p454_p2 = scmp.eq.s32.totalorder %s2432_s1, 1 }
  0x10   : > { %p459_p3 = scmp.ne.s32.totalorder %s2296_s30, %s2292_s0  ;;  %p460_p4 = scmp.eq.s32.totalorder %s1994_s22, 1 }
  0x11   : > { %s2447_s25 = scalar_select %p441_p1, %s2300_s20, %s443_s23  }
  0x12   : > { %p2449_p5 = por %p454_p2, %p453_p0  ;;  %p2453_p6 = por %p460_p4, %p459_p3 }
  0x13   : > { %2942 = sst [smem:[#allocation9_spill]] %s2447_s25  ;;  %p1997_p7 = scmp.ge.s32.totalorder %s2304_s21, 1 }
  0x14   : > { %p539_p8 = scmp.lt.s32.totalorder %s2304_s21, 3 }
  0x16   : > { %p540_p9 = pnand %p1997_p7, %p539_p8 }
  0x17   : > { %p594_p10 = scmp.lt.s32.totalorder (!%p540_p9), %s2432_s1, 1  ;;  %vm602_vm0 = vcmask (!%p540_p9), 261120   ;;  %s2945_s23 = sld [smem:[#allocation10_spill]] (!%p540_p9)  ;;  %v2306_v8 = vmov (!%p540_p9), 0.0   ;;  %vm2307_vm1 = vmmov (!%p540_p9), 0   ;;  %v693_v24 = vlaneseq (!%p540_p9) }
  0x18   : > { %543 = sbr.rel (%p540_p9) target bundleno = 2350 (0x92e), region = 96  ;;  %s2946_s20 = sld [smem:[#allocation13_spill]] (!%p540_p9)  ;;  %2066 = vmatprep.subr.bf16.mxu0 (!%p540_p9), %v2306_v8  ;;  %2070 = vmatprep.mubr.msk.bf16.mxu0 (!%p540_p9), %vm2307_vm1, %v2306_v8  ;;  %vm708_vm2 = vcmask (!%p540_p9), 1040384   ;;  %vm776_vm3 = vcmask (!%p540_p9), 523264   ;;  %v2012_v60 = vld [vmem:[%s2915_s7] ss:$0 sm:$0xff] (!%p540_p9) }
  0x19   : > { %2074 = vmatprep.subr.bf16.mxu1 (!%p540_p9), %v2306_v8  ;;  %2082 = vmatprep.mubr.msk.bf16.mxu1 (!%p540_p9), %vm2307_vm1, %v2306_v8  ;;  %s2948_s22 = sld [smem:[#allocation11_spill]] (!%p540_p9)  ;;  %s2950_s6 = sld [smem:[#allocation16_spill]] (!%p540_p9)  ;;  %v2508_v25 = vshrl.u32 (!%p540_p9), %v693_v24, 7  ;;  %vm1590_vm5 = vcmask (!%p540_p9), 1041409   ;;  %vm1593_vm6 = vcmask (!%p540_p9), 1042434   ;;  %vm1596_vm7 = vcmask (!%p540_p9), 1043459  }
  0x1a   : > { %s2951_s4 = sld [smem:[#allocation14_spill]] (!%p540_p9)  ;;  %s2952_s5 = sld [smem:[#allocation15_spill]] (!%p540_p9)  ;;  %vm1599_vm8 = vcmask (!%p540_p9), 1044484   ;;  %vm1602_vm9 = vcmask (!%p540_p9), 1045509   ;;  %vm1605_vm10 = vcmask (!%p540_p9), 1046534   ;;  %vm1608_vm11 = vcmask (!%p540_p9), 1047559  }
  0x1b   : > { %v695_v26 = vsub.s32 (!%p540_p9), 3, %v2508_v25  ;;  %v712_v28 = vsub.s32 (!%p540_p9), 2, %v2508_v25  ;;  %v722_v30 = vsub.s32 (!%p540_p9), 1, %v2508_v25  ;;  %v2526_v37 = vsub.s32 (!%p540_p9), 0, %v2508_v25 }
  0x1e   : > { %s2947_s2 = smov (!%p540_p9), %s2946_s20  ;;  %v2169_v7 = vld [vmem:[%s2946_s20] sm:$0xff] (!%p540_p9)   ;;  %s2309_s20 = smov (!%p540_p9), 64  }
  0x1f   : > { %s595_s27 = scalar_select %p594_p10, %s2432_s1, 1  ;;  %2067 = vmatpush3.bf16.msra.mxu0 %v2169_v7  ;;  %v2170_v9 = vld [vmem:[%s2947_s2 + $0x8] sm:$0xff]   ;;  %v2000_v14 = vld [vmem:[%s2948_s22] ss:$0 sm:$0xff]  ;;  %v2173_v22 = vld [vmem:[%s2950_s6 + $0x10] sm:$0xff]   ;;  %v1061_v7 = vsub.s32 5, %v2508_v25 }
  0x20   : > { %2068 = vmatprep.subr.bf16.mxu0 %v2306_v8  ;;  %v2171_v20 = vld [vmem:[%s2950_s6] sm:$0xff]   ;;  %v2172_v21 = vld [vmem:[%s2950_s6 + $0x8] sm:$0xff]   ;;  %v2174_v23 = vld [vmem:[%s2950_s6 + $0x18] sm:$0xff]  }
  0x21   : > { %s1999_s28 = sshll.u32 %s595_s27, 3  ;;  %2075 = vmatpush3.bf16.msra.mxu1 %v2171_v20  ;;  %v691_v27 = vld [vmem:[%s2951_s4] sm:$0xf]  ;;  %s591_s27 = sand.u32 1, %s2296_s30  }
  0x22   : > { %s2464_s24 = scalar_lea.vmem %s2945_s23, %s1999_s28  ;;  %s2949_s28 = sld [smem:[#allocation12_spill]]  ;;  %2076 = vmatprep.subr.bf16.mxu1 %v2306_v8  ;;  %v696_v29 = vrot.slane %v691_v27, %v695_v26  ;;  %v2005_v32 = vld [vmem:[%s2952_s5] ss:$0 sm:$0xff]  ;;  %v713_v33 = vrot.slane %v691_v27, %v712_v28  ;;  %v723_v41 = vrot.slane %v691_v27, %v722_v30  ;;  %v733_v47 = vrot.slane %v691_v27, %v2526_v37 }
  0x23   : > { %v599_v0 = vld [vmem:[%s2464_s24] sm:$0xff]  ;;  %2069 = vmatpush3.bf16.msra.mxu0 %v2170_v9 }
  0x24   : > { %v603_v1 = vsel %vm602_vm0, %v599_v0, 0.0  ;;  %2106 = vmatprep.subr.bf16.mxu0 %v2306_v8 }
  0x25   : > { %604 = vadd.xlane.f32.xlu0 %v603_v1  ;;  %2077 = vmatpush3.bf16.msra.mxu1 %v2172_v21 }
  0x26   : > { %2078 = vmatprep.subr.bf16.mxu1 %v2306_v8 }
  0x28   : > { %v2001_v16 = vld [vmem:[%s2949_s28] ss:$0 sm:$0xff]  ;;  %s1922_s28 = scalar_lea.sflag [#allocation5], %s591_s27 }
  0x29   : > { %2079 = vmatpush3.bf16.msra.mxu1 %v2173_v22 }
  0x2a   : > { %2080 = vmatprep.subr.bf16.mxu1 %v2306_v8 }
  0x2d   : > { %2081 = vmatpush3.bf16.msra.mxu1 %v2174_v23 }
  0x2e   : > { %2086 = vmatprep.subr.bf16.mxu1 %v2306_v8 }
  0xb2   : > { %v605_v2 = vpop.xlane.xlu0 %604 }
  0xb3   : > { %v607_v3 = vmul.f32 0.03125, %v605_v2  ;;  %v1049_v2 = vsub.s32 4, %v2508_v25 }
  0xb5   : > { %v608_v4 = vsub.f32 %v599_v0, %v607_v3 }
  0xb7   : > { %v609_v5 = vmul.f32 %v608_v4, %v608_v4 }
  0xb9   : > { %v610_v6 = vsel %vm602_vm0, %v609_v5, 0.0 }
  0xba   : > { %611 = vadd.xlane.f32.xlu0 %v610_v6 }
 0x147   : > { %v612_v10 = vpop.xlane.xlu0 %611 }
 0x148   : > { %v613_v11 = vmul.f32 0.03125, %v612_v10  ;;  %v1073_v10 = vsub.s32 6, %v2508_v25 }
 0x14a   : > { %v614_v12 = vadd.f32 1e-05, %v613_v11 }
 0x14c   : > { %2189 = vrsqrt.f32 %v614_v12 }
 0x156   : > { %v2190_v13 = vpop.eup %2189 }
 0x157   : > { %v616_v15 = vmul.f32 %v2190_v13, %v608_v4  ;;  %v1085_v13 = vsub.s32 7, %v2508_v25 }
 0x159   : > { %v623_v17 = vmul.f32 %v2000_v14, %v616_v15 }
 0x15b   : > { %v630_v18 = vadd.f32 %v2001_v16, %v623_v17 }
 0x15d   : > { %v631_v19 = vpack.c.bf16 %v630_v18, %v630_v18  ;;  %v2308_v18 = vmov 1966171168  }
 0x15f   : > { %2071 = vmatmul.mubr.msk.bf16.vlgmr.msra.gmra.mrb[0].mxu0 %vm602_vm0, %v631_v19  ;;  %v848_v19 = vunpack.c.l.s4 %v2308_v18 }
 0x160   : > { %2122 = vmatprep.mubr.msk.bf16.mxu0 %vm2307_vm1, %v2306_v8 }
 0x161   : > { %v849_v21 = vunpack.c.0.s8 %v848_v19 }
 0x163   : > { %v2581_v23 = vsub.s32 %v849_v21, %v2508_v25 }
 0x232   : > { %v2518_v31 = vpop.f32.mrb[0].mxu0 }
 0x233   : > { %v697_v34 = vmul.f32 %v696_v29, %v2518_v31  ;;  %v706_v35 = vrot.slane %v2518_v31, 7  ;;  %v2072_v36 = vpop.f32.mrb[1].mxu0  ;;  %v2014_v17 = vmul.f32 -1.442695, %v2518_v31 }
 0x234   : > { %v688_v38 = vpop.f32.mrb[2].mxu0 }
 0x235   : > { %v704_v39 = vadd.f32 %v2005_v32, %v697_v34  ;;  %v709_v40 = vsel %vm708_vm2, 0.0, %v706_v35  ;;  %v2073_v42 = vpop.f32.mrb[3].mxu0 }
 0x236   : > { %v714_v43 = vmul.f32 %v713_v33, %v709_v40  ;;  %v717_v44 = vrot.slane %v709_v40, 7 }
 0x238   : > { %v715_v45 = vadd.f32 %v714_v43, %v704_v39  ;;  %v719_v46 = vsel %vm708_vm2, 0.0, %v717_v44 }
 0x239   : > { %v724_v48 = vmul.f32 %v723_v41, %v719_v46  ;;  %v727_v49 = vrot.slane %v719_v46, 7  ;;  %v836_v41 = vld [vmem:[%s2916_s8] sm:$0xff] }
 0x23b   : > { %v725_v50 = vadd.f32 %v724_v48, %v715_v45  ;;  %v729_v51 = vsel %vm708_vm2, 0.0, %v727_v49  ;;  %v837_v45 = vld [vmem:[%s2916_s8 + $0x8] sm:$0xff] }
 0x23c   : > { %v734_v52 = vmul.f32 %v733_v47, %v729_v51 }
 0x23e   : > { %v735_v53 = vadd.f32 %v734_v52, %v725_v50 }
 0x240   : > { %v2006_v54 = vmul.f32 -1.442695, %v735_v53 }
 0x242   : > { %2191 = vpow2.f32 %v2006_v54 }
 0x24c   : > { %v2192_v55 = vpop.eup %2191 }
 0x24d   : > { %v739_v56 = vadd.f32 1.0, %v2192_v55 }
 0x24f   : > { %2193 = vrcp.f32 %v739_v56 }
 0x259   : > { %v2194_v57 = vpop.eup %2193 }
 0x25a   : > { %v2532_v58 = vmul.f32 %v2194_v57, %v735_v53 }
 0x25c   : > { %v743_v59 = vpack.c.bf16 %v2532_v58, %v2532_v58 }
 0x25e   : > { %2083 = vmatmul.mubr.msk.bf16.vlgmr.msra.gmra.mrb[0].mxu1 %vm776_vm3, %v743_v59 }
 0x25f   : > { %2094 = vmatprep.mubr.msk.bf16.mxu1 %vm2307_vm1, %v2306_v8 }
 0x331   : > { %v814_v61 = vpop.f32.mrb[0].mxu1 }
 0x332   : > { %v827_v62 = vadd.f32 %v2012_v60, %v814_v61  ;;  %v2084_v63 = vpop.f32.mrb[1].mxu1  ;;  %v2542_v0 = vrot.slane %v814_v61, %v722_v30  ;;  %v2545_v1 = vrot.slane %v814_v61, %v2526_v37  ;;  %v2550_v6 = vrot.slane %v814_v61, %v1049_v2 }
 0x333   : > { %v817_v3 = vpop.f32.mrb[2].mxu1  ;;  %v2555_v9 = vrot.slane %v814_v61, %v1061_v7  ;;  %v2560_v11 = vrot.slane %v814_v61, %v1073_v10  ;;  %v2562_v12 = vrot.slane %v814_v61, %v712_v28  ;;  %v2567_v16 = vrot.slane %v814_v61, %v1085_v13 }
 0x334   : > { %v829_v4 = vmul.f32 1.442695, %v827_v62  ;;  %1017 = vbcast.lane.b32.xlu0 %v2542_v0, 320  ;;  %1005 = vbcast.lane.b32.xlu1 %v2545_v1, 320  ;;  %v2085_v5 = vpop.f32.mrb[3].mxu1  ;;  %v2574_v20 = vrot.slane %v814_v61, %v695_v26  ;;  %vm828_vm4 = vcmp.gt.f32.partialorder %v827_v62, 20.0 }
 0x336   : > { %2195 = vpow2.f32 %v829_v4 }
 0x338   : > { %1057 = vbcast.lane.b32.xlu0 %v2550_v6, 328  ;;  %1009 = vbcast.lane.b32.xlu1 %v2545_v1, 328 }
 0x33c   : > { %1069 = vbcast.lane.b32.xlu0 %v2555_v9, 328  ;;  %1021 = vbcast.lane.b32.xlu1 %v2542_v0, 328 }
 0x340   : > { %v2196_v14 = vpop.eup %2195  ;;  %1081 = vbcast.lane.b32.xlu0 %v2560_v11, 328  ;;  %1029 = vbcast.lane.b32.xlu1 %v2562_v12, 320 }
 0x341   : > { %v831_v15 = vadd.f32 1.0, %v2196_v14 }
 0x343   : > { %2197 = vlog2.f32 %v831_v15 }
 0x344   : > { %1093 = vbcast.lane.b32.xlu0 %v2567_v16, 328  ;;  %1033 = vbcast.lane.b32.xlu1 %v2562_v12, 328  ;;  %2199 = vpow2.f32 %v2014_v17 }
 0x348   : > { %1341 = vbcast.lane.b32.xlu0 %v2542_v0, 344  ;;  %1041 = vbcast.lane.b32.xlu1 %v2574_v20, 320 }
 0x34c   : > { %1349 = vbcast.lane.b32.xlu0 %v2562_v12, 344  ;;  %1045 = vbcast.lane.b32.xlu1 %v2574_v20, 328 }
 0x34d   : > { %v2198_v22 = vpop.eup %2197 }
 0x34e   : > { %v833_v24 = vmul.f32 0.6931472, %v2198_v22  ;;  %v2200_v26 = vpop.eup %2199 }
 0x34f   : > { %v1513_v35 = vadd.f32 1.0, %v2200_v26 }
 0x350   : > { %v834_v27 = vsel %vm828_vm4, %v827_v62, %v833_v24  ;;  %1333 = vbcast.lane.b32.xlu0 %v2545_v1, 344  ;;  %1053 = vbcast.lane.b32.xlu1 %v2550_v6, 320 }
 0x351   : > { %v846_v28 = vcombine.high %v834_v27, %v834_v27  ;;  %v853_v29 = vrot.slane %v834_v27, %v2581_v23  ;;  %v835_v30 = vmul.f32 %v834_v27, %v2532_v58  ;;  %2201 = vrcp.f32 %v1513_v35 }
 0x353   : > { %v860_v32 = vrot.slane %v846_v28, %v2581_v23  ;;  %v861_v33 = vcombine.high %v853_v29, %v853_v29  ;;  %v869_v34 = vrot.slane %v853_v29, %v2581_v23  ;;  %v1103_v25 = vrot.slane %v835_v30, %v2581_v23 }
 0x354   : > { %1357 = vbcast.lane.b32.xlu0 %v2574_v20, 344  ;;  %1065 = vbcast.lane.b32.xlu1 %v2555_v9, 320  ;;  %v1096_v36 = vcombine.high %v835_v30, %v835_v30 }
 0x355   : > { %v862_v38 = vcombine.high %v860_v32, %v860_v32  ;;  %v883_v39 = vrot.slane %v861_v33, %v2581_v23  ;;  %v891_v40 = vcombine.high %v869_v34, %v869_v34  ;;  %v898_v42 = vrot.slane %v869_v34, %v2526_v37 }
 0x356   : > { %v2598_v43 = vrot.slane %v1103_v25, %v2581_v23  ;;  %v2601_v44 = vrot.slane %v1096_v36, %v2581_v23  ;;  %v876_v46 = vrot.slane %v860_v32, %v2581_v23  ;;  %v1111_v56 = vcombine.high %v1103_v25, %v1103_v25 }
 0x357   : > { %v893_v47 = vcombine.high %v883_v39, %v883_v39  ;;  %v902_v48 = vrot.slane %v883_v39, %v2526_v37  ;;  %v890_v49 = vrot.slane %v862_v38, %v2581_v23  ;;  %v906_v50 = vrot.slane %v891_v40, %v2526_v37 }
 0x358   : > { %1365 = vbcast.lane.b32.xlu0 %v2550_v6, 344  ;;  %v935_v52 = vmul.f32 %v898_v42, %v836_v41  ;;  %1077 = vbcast.lane.b32.xlu1 %v2560_v11, 320  ;;  %v936_v53 = vmul.f32 %v898_v42, %v837_v45  ;;  %v892_v57 = vcombine.high %v876_v46, %v876_v46 }
 0x359   : > { %v910_v51 = vrot.slane %v893_v47, %v2526_v37  ;;  %v937_v54 = vmul.f32 %v902_v48, %v836_v41  ;;  %v938_v55 = vmul.f32 %v902_v48, %v837_v45  ;;  %v914_v59 = vrot.slane %v876_v46, %v2526_v37 }
 0x35a   : > { %v939_v60 = vmul.f32 %v906_v50, %v836_v41  ;;  %v894_v61 = vcombine.high %v890_v49, %v890_v49  ;;  %v940_v62 = vmul.f32 %v906_v50, %v837_v45  ;;  %v918_v63 = vrot.slane %v890_v49, %v2526_v37 }
 0x35b   : > { %v941_v2 = vmul.f32 %v910_v51, %v836_v41  ;;  %v942_v3 = vmul.f32 %v910_v51, %v837_v45  ;;  %v951_v4 = vmul.f32 1.442695, %v935_v52  ;;  %v953_v5 = vmul.f32 1.442695, %v936_v53  ;;  %v2202_v27 = vpop.eup %2201 }
 0x35c   : > { %1373 = vbcast.lane.b32.xlu0 %v2555_v9, 344  ;;  %1089 = vbcast.lane.b32.xlu1 %v2567_v16, 320  ;;  %v955_v7 = vmul.f32 1.442695, %v937_v54  ;;  %v957_v10 = vmul.f32 1.442695, %v938_v55  ;;  %v2618_v13 = vrot.slane %v1111_v56, %v2581_v23  ;;  %v922_v14 = vrot.slane %v892_v57, %v2526_v37 }
 0x35d   : > { %v943_v15 = vmul.f32 %v914_v59, %v836_v41  ;;  %2203 = vpow2.f32 %v951_v4  ;;  %v959_v17 = vmul.f32 1.442695, %v939_v60  ;;  %v944_v18 = vmul.f32 %v914_v59, %v837_v45 }
 0x35e   : > { %2205 = vpow2.f32 %v953_v5  ;;  %v961_v19 = vmul.f32 1.442695, %v940_v62  ;;  %v926_v21 = vrot.slane %v894_v61, %v2526_v37  ;;  %v945_v22 = vmul.f32 %v918_v63, %v836_v41 }
 0x35f   : > { %2207 = vpow2.f32 %v955_v7  ;;  %v963_v24 = vmul.f32 1.442695, %v941_v2  ;;  %v946_v26 = vmul.f32 %v918_v63, %v837_v45  ;;  %v965_v28 = vmul.f32 1.442695, %v942_v3  ;;  %v2177_v63 = vld [vmem:[%s2918_s10 + $0x10] sm:$0xff]   ;;  %v2178_v2 = vld [vmem:[%s2918_s10 + $0x18] sm:$0xff]  }
 0x360   : > { %2209 = vpow2.f32 %v957_v10  ;;  %v947_v29 = vmul.f32 %v922_v14, %v836_v41  ;;  %v967_v30 = vmul.f32 1.442695, %v943_v15  ;;  %1381 = vbcast.lane.b32.xlu0 %v2560_v11, 344  ;;  %1337 = vbcast.lane.b32.xlu1 %v2542_v0, 336  ;;  %v2626_v32 = vrot.slane %v2601_v44, %v2581_v23 }
 0x361   : > { %2211 = vpow2.f32 %v959_v17  ;;  %v948_v33 = vmul.f32 %v922_v14, %v837_v45  ;;  %v969_v34 = vmul.f32 1.442695, %v944_v18  ;;  %v1112_v25 = vcombine.high %v2601_v44, %v2601_v44 }
 0x362   : > { %2213 = vpow2.f32 %v961_v19  ;;  %v2631_v35 = vmul.f32 %v2202_v27, %v2518_v31  ;;  %v949_v36 = vmul.f32 %v926_v21, %v836_v41  ;;  %v971_v38 = vmul.f32 1.442695, %v945_v22 }
 0x363   : > { %2215 = vpow2.f32 %v963_v24  ;;  %v950_v39 = vmul.f32 %v926_v21, %v837_v45  ;;  %v973_v40 = vmul.f32 1.442695, %v946_v26  ;;  %v2634_v0 = vrot.slane %v1112_v25, %v2581_v23 }
 0x364   : > { %2217 = vpow2.f32 %v965_v28  ;;  %v975_v42 = vmul.f32 1.442695, %v947_v29  ;;  %1389 = vbcast.lane.b32.xlu0 %v2567_v16, 344  ;;  %1345 = vbcast.lane.b32.xlu1 %v2562_v12, 336  ;;  %v977_v44 = vmul.f32 1.442695, %v948_v33  ;;  %v1152_v3 = vrot.slane %v2618_v13, %v2526_v37 }
 0x365   : > { %2219 = vpow2.f32 %v967_v30  ;;  %v979_v31 = vmul.f32 1.442695, %v949_v36  ;;  %v1519_v41 = vrot.slane %v2631_v35, 2  ;;  %v981_v45 = vmul.f32 1.442695, %v950_v39 }
 0x366   : > { %2221 = vpow2.f32 %v969_v34  ;;  %v1520_v49 = vrot.slane %v2631_v35, 3  ;;  %v1522_v53 = vrot.slane %v2631_v35, 5  ;;  %v1524_v57 = vrot.slane %v2631_v35, 7 }
 0x367   : > { %v2204_v46 = vpop.eup %2203  ;;  %2223 = vpow2.f32 %v971_v38  ;;  %v1521_v62 = vrot.slane %v2631_v35, 4  ;;  %v1148_v4 = vrot.slane %v2598_v43, %v2526_v37  ;;  %v2700_v15 = vrot.slane %v2626_v32, %v2526_v37 }
 0x368   : > { %v2206_v47 = vpop.eup %2205  ;;  %2225 = vpow2.f32 %v973_v40  ;;  %983 = vst.msk [vmem:[#allocation2] sm:$0xff] %vm776_vm3, %v2204_v46  ;;  %1529 = vrot.lane.b32.xlu0 %v1519_v41, %s2309_s20  ;;  %1329 = vbcast.lane.b32.xlu1 %v2545_v1, 336  ;;  %v2707_v24 = vrot.slane %v2634_v0, %v2526_v37  ;;  %v1142_v27 = vcombine.high %v2626_v32, %v2626_v32 }
 0x369   : > { %v2208_v23 = vpop.eup %2207  ;;  %2227 = vpow2.f32 %v975_v42  ;;  %984 = vst.msk [vmem:[#allocation2 + $0x8] sm:$0xff] %vm776_vm3, %v2206_v47  ;;  %v1141_v26 = vcombine.high %v2598_v43, %v2598_v43  ;;  %v1144_v43 = vcombine.high %v2634_v0, %v2634_v0 }
 0x36a   : > { %v2210_v12 = vpop.eup %2209  ;;  %2229 = vpow2.f32 %v977_v44  ;;  %985 = vst.msk [vmem:[#allocation2 + $0x10] sm:$0xff] %vm776_vm3, %v2208_v23  ;;  %v2717_v38 = vrot.slane %v1142_v27, %v2526_v37 }
 0x36b   : > { %v2212_v48 = vpop.eup %2211  ;;  %2231 = vpow2.f32 %v979_v31  ;;  %986 = vst.msk [vmem:[#allocation2 + $0x18] sm:$0xff] %vm776_vm3, %v2210_v12  ;;  %v1156_v32 = vrot.slane %v1141_v26, %v2526_v37  ;;  %v2727_v0 = vrot.slane %v1144_v43, %v2526_v37 }
 0x36c   : > { %v2214_v50 = vpop.eup %2213  ;;  %2233 = vpow2.f32 %v981_v45  ;;  %987 = vst.msk [vmem:[#allocation2 + $0x20] sm:$0xff] %vm776_vm3, %v2212_v48  ;;  %1531 = vrot.lane.b32.xlu0 %v1520_v49, %s2309_s20  ;;  %1353 = vbcast.lane.b32.xlu1 %v2574_v20, 336  ;;  %v1143_v48 = vcombine.high %v2618_v13, %v2618_v13 }
 0x36d   : > { %v2216_v51 = vpop.eup %2215  ;;  %988 = vst.msk [vmem:[#allocation2 + $0x28] sm:$0xff] %vm776_vm3, %v2214_v50 }
 0x36e   : > { %v2218_v1 = vpop.eup %2217  ;;  %989 = vst.msk [vmem:[#allocation2 + $0x30] sm:$0xff] %vm776_vm3, %v2216_v51 }
 0x36f   : > { %v2220_v52 = vpop.eup %2219  ;;  %990 = vst.msk [vmem:[#allocation2 + $0x38] sm:$0xff] %vm776_vm3, %v2218_v1  ;;  %v1217_v22 = vld [vmem:[#allocation2] sm:$0xff] }
 0x370   : > { %v2222_v54 = vpop.eup %2221  ;;  %991 = vst.msk [vmem:[#allocation2 + $0x40] sm:$0xff] %vm776_vm3, %v2220_v52  ;;  %1535 = vrot.lane.b32.xlu0 %v1522_v53, %s2309_s20  ;;  %1361 = vbcast.lane.b32.xlu1 %v2550_v6, 336  ;;  %v1518_v6 = vrot.slane %v2631_v35, 1  ;;  %v1219_v30 = vmul.f32 0.0, %v1217_v22 }
 0x371   : > { %v2224_v55 = vpop.eup %2223  ;;  %992 = vst.msk [vmem:[#allocation2 + $0x48] sm:$0xff] %vm776_vm3, %v2222_v54  ;;  %v1228_v39 = vld [vmem:[#allocation2 + $0x10] sm:$0xff] }
 0x372   : > { %v2226_v56 = vpop.eup %2225  ;;  %993 = vst.msk [vmem:[#allocation2 + $0x50] sm:$0xff] %vm776_vm3, %v2224_v55  ;;  %v1229_v49 = vld [vmem:[#allocation2 + $0x18] sm:$0xff] }
 0x373   : > { %v2228_v20 = vpop.eup %2227  ;;  %994 = vst.msk [vmem:[#allocation2 + $0x58] sm:$0xff] %vm776_vm3, %v2226_v56  ;;  %v1160_v56 = vrot.slane %v1143_v48, %v2526_v37  ;;  %v1240_v13 = vld [vmem:[#allocation2 + $0x20] sm:$0xff] }
 0x374   : > { %v2230_v59 = vpop.eup %2229  ;;  %995 = vst.msk [vmem:[#allocation2 + $0x60] sm:$0xff] %vm776_vm3, %v2228_v20  ;;  %1539 = vrot.lane.b32.xlu0 %v1524_v57, %s2309_s20  ;;  %1369 = vbcast.lane.b32.xlu1 %v2555_v9, 336  ;;  %v2175_v9 = vld [vmem:[%s2918_s10] sm:$0xff]  }
 0x375   : > { %v2232_v60 = vpop.eup %2231  ;;  %996 = vst.msk [vmem:[#allocation2 + $0x68] sm:$0xff] %vm776_vm3, %v2230_v59  ;;  %2087 = vmatpush3.bf16.msra.mxu1 %v2175_v9  ;;  %v1252_v37 = vld [vmem:[#allocation2 + $0x30] sm:$0xff] }
 0x376   : > { %v2234_v61 = vpop.eup %2233  ;;  %997 = vst.msk [vmem:[#allocation2 + $0x70] sm:$0xff] %vm776_vm3, %v2232_v60  ;;  %2088 = vmatprep.subr.bf16.mxu1 %v2306_v8 }
 0x377   : > { %998 = vst.msk [vmem:[#allocation2 + $0x78] sm:$0xff] %vm776_vm3, %v2234_v61 }
 0x378   : > { %1377 = vbcast.lane.b32.xlu1 %v2560_v11, 336  ;;  %v1523_v11 = vrot.slane %v2631_v35, 6  ;;  %v1265_v26 = vld [vmem:[#allocation2 + $0x48] sm:$0xff] }
 0x379   : > { %v1276_v43 = vld [vmem:[#allocation2 + $0x50] sm:$0xff] }
 0x37c   : > { %1385 = vbcast.lane.b32.xlu1 %v2567_v16, 336  ;;  %v2176_v16 = vld [vmem:[%s2918_s10 + $0x8] sm:$0xff]  }
 0x37d   : > { %2089 = vmatpush3.bf16.msra.mxu1 %v2176_v16 }
 0x37e   : > { %2090 = vmatprep.subr.bf16.mxu1 %v2306_v8 }
 0x380   : > { %1527 = vrot.lane.b32.xlu1 %v1518_v6, %s2309_s20  ;;  %v1241_v6 = vld [vmem:[#allocation2 + $0x28] sm:$0xff] }
 0x381   : > { %2091 = vmatpush3.bf16.msra.mxu1 %v2177_v63 }
 0x382   : > { %2092 = vmatprep.subr.bf16.mxu1 %v2306_v8 }
 0x384   : > { %1525 = vrot.lane.b32.xlu1 %v2631_v35, %s2309_s20  ;;  %v1218_v35 = vld [vmem:[#allocation2 + $0x8] sm:$0xff] }
 0x385   : > { %2093 = vmatpush3.bf16.msra.mxu1 %v2178_v2  ;;  %v1220_v46 = vmul.f32 0.0, %v1218_v35 }
 0x386   : > { %2098 = vmatprep.subr.bf16.mxu1 %v2306_v8 }
 0x388   : > { %1533 = vrot.lane.b32.xlu1 %v1521_v62, %s2309_s20 }
 0x38c   : > { %1537 = vrot.lane.b32.xlu1 %v1523_v11, %s2309_s20  ;;  %s2038_s20 = sshll.u32 %s2432_s1, 7  ;;  %s2310_s1 = smov [#allocation4]  }
 0x38d   : > { %s2865_s6 = scalar_lea.hbm %s2927_s19, %s2038_s20 }
 0x3a6   : > { %v1018_v5 = vpop.permute.xlu0 %1017  ;;  %v1006_v7 = vpop.permute.xlu1 %1005 }
 0x3a7   : > { %v1187_v10 = vmul.f32 %v1152_v3, %v1018_v5  ;;  %v1185_v14 = vmul.f32 %v1148_v4, %v1006_v7 }
 0x3a9   : > { %1203 = vst.msk [vmem:[#allocation3 + $0x10] sm:$0xff] %vm776_vm3, %v1187_v10  ;;  %1201 = vst.msk [vmem:[#allocation3] sm:$0xff] %vm776_vm3, %v1185_v14 }
 0x3aa   : > { %v1058_v17 = vpop.permute.xlu0 %1057  ;;  %v1010_v18 = vpop.permute.xlu1 %1009 }
 0x3ab   : > { %v1194_v19 = vmul.f32 %v2700_v15, %v1058_v17  ;;  %v1186_v21 = vmul.f32 %v1148_v4, %v1010_v18  ;;  %v1253_v17 = vld [vmem:[#allocation2 + $0x38] sm:$0xff] }
 0x3ad   : > { %1210 = vst.msk [vmem:[#allocation3 + $0x48] sm:$0xff] %vm776_vm3, %v1194_v19  ;;  %1202 = vst.msk [vmem:[#allocation3 + $0x8] sm:$0xff] %vm776_vm3, %v1186_v21 }
 0x3ae   : > { %v1070_v28 = vpop.permute.xlu0 %1069  ;;  %v1022_v29 = vpop.permute.xlu1 %1021 }
 0x3af   : > { %v1196_v33 = vmul.f32 %v2707_v24, %v1070_v28  ;;  %v1188_v34 = vmul.f32 %v1152_v3, %v1022_v29  ;;  %v1264_v28 = vld [vmem:[#allocation2 + $0x40] sm:$0xff] }
 0x3b0   : > { %v1221_v25 = vld [vmem:[#allocation3] sm:$0xff]  ;;  %v1233_v47 = vld [vmem:[#allocation3 + $0x10] sm:$0xff] }
 0x3b1   : > { %v1223_v36 = vadd.f32 %v1221_v25, %v1219_v30  ;;  %1212 = vst.msk [vmem:[#allocation3 + $0x58] sm:$0xff] %vm776_vm3, %v1196_v33  ;;  %1204 = vst.msk [vmem:[#allocation3 + $0x18] sm:$0xff] %vm776_vm3, %v1188_v34 }
 0x3b2   : > { %v1082_v40 = vpop.permute.xlu0 %1081  ;;  %v1030_v42 = vpop.permute.xlu1 %1029 }
 0x3b3   : > { %v1230_v44 = vmul.f32 %v1228_v39, %v1223_v36  ;;  %1225 = vst.msk [vmem:[#allocation2] sm:$0xff] %vm776_vm3, %v1223_v36  ;;  %v1198_v31 = vmul.f32 %v2717_v38, %v1082_v40  ;;  %v1189_v41 = vmul.f32 %v1156_v32, %v1030_v42 }
 0x3b4   : > { %v1222_v45 = vld [vmem:[#allocation3 + $0x8] sm:$0xff] }
 0x3b5   : > { %v1224_v23 = vadd.f32 %v1222_v45, %v1220_v46  ;;  %1214 = vst.msk [vmem:[#allocation3 + $0x68] sm:$0xff] %vm776_vm3, %v1198_v31  ;;  %1205 = vst.msk [vmem:[#allocation3 + $0x20] sm:$0xff] %vm776_vm3, %v1189_v41  ;;  %v1235_v12 = vadd.f32 %v1233_v47, %v1230_v44  ;;  %v1270_v33 = vld [vmem:[#allocation3 + $0x48] sm:$0xff] }
 0x3b6   : > { %v1094_v50 = vpop.permute.xlu0 %1093  ;;  %v1034_v51 = vpop.permute.xlu1 %1033 }
 0x3b7   : > { %1226 = vst.msk [vmem:[#allocation2 + $0x8] sm:$0xff] %vm776_vm3, %v1224_v23  ;;  %v1231_v1 = vmul.f32 %v1229_v49, %v1224_v23  ;;  %1237 = vst.msk [vmem:[#allocation2 + $0x10] sm:$0xff] %vm776_vm3, %v1235_v12  ;;  %v1200_v52 = vmul.f32 %v2727_v0, %v1094_v50  ;;  %v1190_v53 = vmul.f32 %v1156_v32, %v1034_v51  ;;  %v1288_v23 = vld [vmem:[#allocation2 + $0x60] sm:$0xff] }
 0x3b8   : > { %v1234_v54 = vld [vmem:[#allocation3 + $0x18] sm:$0xff]  ;;  %v1242_v57 = vmul.f32 %v1240_v13, %v1235_v12  ;;  %v1289_v12 = vld [vmem:[#allocation2 + $0x68] sm:$0xff] }
 0x3b9   : > { %v1236_v55 = vadd.f32 %v1234_v54, %v1231_v1  ;;  %1216 = vst.msk [vmem:[#allocation3 + $0x78] sm:$0xff] %vm776_vm3, %v1200_v52  ;;  %1206 = vst.msk [vmem:[#allocation3 + $0x28] sm:$0xff] %vm776_vm3, %v1190_v53  ;;  %v1282_v44 = vld [vmem:[#allocation3 + $0x58] sm:$0xff] }
 0x3ba   : > { %v1042_v20 = vpop.permute.xlu1 %1041  ;;  %v1342_v63 = vpop.permute.xlu0 %1341  ;;  %v1301_v13 = vld [vmem:[#allocation2 + $0x78] sm:$0xff] }
 0x3bb   : > { %1238 = vst.msk [vmem:[#allocation2 + $0x18] sm:$0xff] %vm776_vm3, %v1236_v55  ;;  %v1191_v59 = vmul.f32 %v1160_v56, %v1042_v20  ;;  %v1243_v62 = vmul.f32 %v1241_v6, %v1236_v55  ;;  %v1300_v20 = vld [vmem:[#allocation2 + $0x70] sm:$0xff] }
 0x3bc   : > { %v1245_v60 = vld [vmem:[#allocation3 + $0x20] sm:$0xff]  ;;  %v1294_v50 = vld [vmem:[#allocation3 + $0x68] sm:$0xff] }
 0x3bd   : > { %v1247_v61 = vadd.f32 %v1245_v60, %v1242_v57  ;;  %1207 = vst.msk [vmem:[#allocation3 + $0x30] sm:$0xff] %vm776_vm3, %v1191_v59 }
 0x3be   : > { %v1046_v9 = vpop.permute.xlu1 %1045  ;;  %v1350_v14 = vpop.permute.xlu0 %1349  ;;  %v1313_v54 = vld [vmem:[#allocation2 + $0x10] sm:$0xff] }
 0x3bf   : > { %1249 = vst.msk [vmem:[#allocation2 + $0x20] sm:$0xff] %vm776_vm3, %v1247_v61  ;;  %v1192_v11 = vmul.f32 %v1160_v56, %v1046_v9  ;;  %v1254_v4 = vmul.f32 %v1252_v37, %v1247_v61 }
 0x3c0   : > { %v1246_v16 = vld [vmem:[#allocation3 + $0x28] sm:$0xff]  ;;  %v1306_v59 = vld [vmem:[#allocation3 + $0x78] sm:$0xff] }
 0x3c1   : > { %v1248_v2 = vadd.f32 %v1246_v16, %v1243_v62  ;;  %1208 = vst.msk [vmem:[#allocation3 + $0x38] sm:$0xff] %vm776_vm3, %v1192_v11 }
 0x3c2   : > { %v1054_v3 = vpop.permute.xlu1 %1053  ;;  %v1334_v34 = vpop.permute.xlu0 %1333  ;;  %v1314_v41 = vld [vmem:[#allocation2 + $0x18] sm:$0xff] }
 0x3c3   : > { %1250 = vst.msk [vmem:[#allocation2 + $0x28] sm:$0xff] %vm776_vm3, %v1248_v2  ;;  %v1193_v5 = vmul.f32 %v2700_v15, %v1054_v3  ;;  %v1255_v19 = vmul.f32 %v1253_v17, %v1248_v2  ;;  %v1394_v51 = vmul.f32 %v1342_v63, %v1314_v41 }
 0x3c4   : > { %v1257_v7 = vld [vmem:[#allocation3 + $0x30] sm:$0xff] }
 0x3c5   : > { %v1259_v10 = vadd.f32 %v1257_v7, %v1254_v4  ;;  %1209 = vst.msk [vmem:[#allocation3 + $0x40] sm:$0xff] %vm776_vm3, %v1193_v5  ;;  %v1417_v60 = vsel %vm776_vm3, %v1394_v51, 0.0  ;;  %v1312_v5 = vld [vmem:[#allocation2 + $0x8] sm:$0xff] }
 0x3c6   : > { %v1066_v18 = vpop.permute.xlu1 %1065  ;;  %v1358_v45 = vpop.permute.xlu0 %1357  ;;  %v1315_v37 = vld [vmem:[#allocation2 + $0x20] sm:$0xff] }
 0x3c7   : > { %1261 = vst.msk [vmem:[#allocation2 + $0x30] sm:$0xff] %vm776_vm3, %v1259_v10  ;;  %v1195_v21 = vmul.f32 %v2707_v24, %v1066_v18  ;;  %v1266_v15 = vmul.f32 %v1264_v28, %v1259_v10  ;;  %v1277_v24 = vld [vmem:[#allocation2 + $0x58] sm:$0xff]  ;;  %v1392_v10 = vmul.f32 %v1334_v34, %v1312_v5 }
 0x3c8   : > { %v1258_v22 = vld [vmem:[#allocation3 + $0x38] sm:$0xff] }
 0x3c9   : > { %v1260_v27 = vadd.f32 %v1258_v22, %v1255_v19  ;;  %1211 = vst.msk [vmem:[#allocation3 + $0x50] sm:$0xff] %vm776_vm3, %v1195_v21  ;;  %v1311_v22 = vld [vmem:[#allocation2] sm:$0xff] }
 0x3ca   : > { %v1078_v30 = vpop.permute.xlu1 %1077  ;;  %v1316_v1 = vld [vmem:[#allocation2 + $0x28] sm:$0xff]  ;;  %v1366_v6 = vpop.permute.xlu0 %1365 }
 0x3cb   : > { %v1267_v29 = vmul.f32 %v1265_v26, %v1260_v27  ;;  %1262 = vst.msk [vmem:[#allocation2 + $0x38] sm:$0xff] %vm776_vm3, %v1260_v27  ;;  %v1197_v35 = vmul.f32 %v2717_v38, %v1078_v30  ;;  %v1396_v61 = vmul.f32 %v1350_v14, %v1316_v1 }
 0x3cc   : > { %v1269_v25 = vld [vmem:[#allocation3 + $0x40] sm:$0xff] }
 0x3cd   : > { %v1272_v36 = vadd.f32 %v1270_v33, %v1267_v29  ;;  %v1271_v32 = vadd.f32 %v1269_v25, %v1266_v15  ;;  %1213 = vst.msk [vmem:[#allocation3 + $0x60] sm:$0xff] %vm776_vm3, %v1197_v35  ;;  %v1426_v7 = vsel %vm776_vm3, %v1396_v61, 0.0  ;;  %v1408_v29 = vsel %vm776_vm3, %v1392_v10, 0.0 }
 0x3ce   : > { %v1090_v42 = vpop.permute.xlu1 %1089  ;;  %v1374_v27 = vpop.permute.xlu0 %1373 }
 0x3cf   : > { %1274 = vst.msk [vmem:[#allocation2 + $0x48] sm:$0xff] %vm776_vm3, %v1272_v36  ;;  %1273 = vst.msk [vmem:[#allocation2 + $0x40] sm:$0xff] %vm776_vm3, %v1271_v32  ;;  %v1278_v39 = vmul.f32 %v1276_v43, %v1271_v32  ;;  %v1279_v40 = vmul.f32 %v1277_v24, %v1272_v36  ;;  %v1199_v31 = vmul.f32 %v2727_v0, %v1090_v42  ;;  %v1317_v32 = vld [vmem:[#allocation2 + $0x30] sm:$0xff] }
 0x3d0   : > { %v1281_v46 = vld [vmem:[#allocation3 + $0x50] sm:$0xff] }
 0x3d1   : > { %v1283_v47 = vadd.f32 %v1281_v46, %v1278_v39  ;;  %v1284_v38 = vadd.f32 %v1282_v44, %v1279_v40  ;;  %1215 = vst.msk [vmem:[#allocation3 + $0x70] sm:$0xff] %vm776_vm3, %v1199_v31 }
 0x3d2   : > { %v1338_v0 = vpop.permute.xlu1 %1337  ;;  %v1318_v18 = vld [vmem:[#allocation2 + $0x38] sm:$0xff]  ;;  %v1382_v46 = vpop.permute.xlu0 %1381 }
 0x3d3   : > { %1285 = vst.msk [vmem:[#allocation2 + $0x50] sm:$0xff] %vm776_vm3, %v1283_v47  ;;  %v1290_v48 = vmul.f32 %v1288_v23, %v1283_v47  ;;  %1286 = vst.msk [vmem:[#allocation2 + $0x58] sm:$0xff] %vm776_vm3, %v1284_v38  ;;  %v1291_v49 = vmul.f32 %v1289_v12, %v1284_v38  ;;  %v1393_v56 = vmul.f32 %v1338_v0, %v1313_v54 }
 0x3d4   : > { %v1293_v52 = vld [vmem:[#allocation3 + $0x60] sm:$0xff]  ;;  %v1398_v15 = vmul.f32 %v1358_v45, %v1318_v18 }
 0x3d5   : > { %v1296_v53 = vadd.f32 %v1294_v50, %v1291_v49  ;;  %v1295_v55 = vadd.f32 %v1293_v52, %v1290_v48  ;;  %v1416_v62 = vsel %vm776_vm3, %v1393_v56, 0.0  ;;  %v2013_v49 = vld [vmem:[%s2917_s9] ss:$0 sm:$0xff] }
 0x3d6   : > { %v1418_v16 = vadd.f32 %v1417_v60, %v1416_v62  ;;  %v1346_v2 = vpop.permute.xlu1 %1345  ;;  %v1320_v25 = vld [vmem:[#allocation2 + $0x48] sm:$0xff]  ;;  %v1435_v40 = vsel %vm776_vm3, %v1398_v15, 0.0  ;;  %v1319_v23 = vld [vmem:[#allocation2 + $0x40] sm:$0xff] }
 0x3d7   : > { %1298 = vst.msk [vmem:[#allocation2 + $0x68] sm:$0xff] %vm776_vm3, %v1296_v53  ;;  %v1303_v57 = vmul.f32 %v1301_v13, %v1296_v53  ;;  %1297 = vst.msk [vmem:[#allocation2 + $0x60] sm:$0xff] %vm776_vm3, %v1295_v55  ;;  %v1302_v9 = vmul.f32 %v1300_v20, %v1295_v55  ;;  %v1395_v4 = vmul.f32 %v1346_v2, %v1315_v37 }
 0x3d8   : > { %v1305_v11 = vld [vmem:[#allocation3 + $0x70] sm:$0xff]  ;;  %v1419_v14 = vrot.slane %v1418_v16, 4  ;;  %v1400_v42 = vmul.f32 %v1366_v6, %v1320_v25 }
 0x3d9   : > { %v1308_v63 = vadd.f32 %v1306_v59, %v1303_v57  ;;  %v1307_v3 = vadd.f32 %v1305_v11, %v1302_v9  ;;  %v1425_v17 = vsel %vm776_vm3, %v1395_v4, 0.0  ;;  %v2774_v57 = vmul.f32 %v2013_v49, %v2532_v58  ;;  %v1390_v59 = vpop.permute.xlu0 %1389 }
 0x3da   : > { %v1427_v19 = vadd.f32 %v1426_v7, %v1425_v17  ;;  %v1330_v21 = vpop.permute.xlu1 %1329  ;;  %v1420_v30 = vadd.f32 %v1419_v14, %v1418_v16  ;;  %v1322_v44 = vld [vmem:[#allocation2 + $0x58] sm:$0xff]  ;;  %v1444_v1 = vsel %vm776_vm3, %v1400_v42, 0.0  ;;  %v1321_v20 = vld [vmem:[#allocation2 + $0x50] sm:$0xff] }
 0x3db   : > { %1310 = vst.msk [vmem:[#allocation2 + $0x78] sm:$0xff] %vm776_vm3, %v1308_v63  ;;  %1309 = vst.msk [vmem:[#allocation2 + $0x70] sm:$0xff] %vm776_vm3, %v1307_v3  ;;  %v1391_v26 = vmul.f32 %v1330_v21, %v1311_v22  ;;  %v1402_v50 = vmul.f32 %v1374_v27, %v1322_v44  ;;  %v1488_v58 = vrot.slane %v2774_v57, 2 }
 0x3dc   : > { %v1428_v28 = vrot.slane %v1427_v19, 4  ;;  %v1421_v31 = vrot.slane %v1420_v30, 2 }
 0x3dd   : > { %v1407_v33 = vsel %vm776_vm3, %v1391_v26, 0.0  ;;  %v1453_v6 = vsel %vm776_vm3, %v1402_v50, 0.0  ;;  %v1530_v26 = vpop.permute.xlu0 %1529 }
 0x3de   : > { %v1429_v34 = vadd.f32 %v1428_v28, %v1427_v19  ;;  %v1409_v35 = vadd.f32 %v1408_v29, %v1407_v33  ;;  %v1354_v36 = vpop.permute.xlu1 %1353  ;;  %v1422_v0 = vadd.f32 %v1421_v31, %v1420_v30  ;;  %v1324_v54 = vld [vmem:[#allocation2 + $0x68] sm:$0xff]  ;;  %v1323_v10 = vld [vmem:[#allocation2 + $0x60] sm:$0xff] }
 0x3df   : > { %v1397_v43 = vmul.f32 %v1354_v36, %v1317_v32  ;;  %v1404_v11 = vmul.f32 %v1382_v46, %v1324_v54 }
 0x3e0   : > { %v1430_v24 = vrot.slane %v1429_v34, 2  ;;  %v1410_v39 = vrot.slane %v1409_v35, 4  ;;  %v1423_v2 = vrot.slane %v1422_v0, 1 }
 0x3e1   : > { %v1434_v41 = vsel %vm776_vm3, %v1397_v43, 0.0  ;;  %v1462_v27 = vsel %vm776_vm3, %v1404_v11, 0.0  ;;  %v1487_v43 = vrot.slane %v2774_v57, 1  ;;  %v1532_v50 = vpop.permute.xlu0 %1531 }
 0x3e2   : > { %v1411_v47 = vadd.f32 %v1410_v39, %v1409_v35  ;;  %v1436_v38 = vadd.f32 %v1435_v40, %v1434_v41  ;;  %v1362_v45 = vpop.permute.xlu1 %1361  ;;  %v1431_v12 = vadd.f32 %v1430_v24, %v1429_v34  ;;  %v1326_v16 = vld [vmem:[#allocation2 + $0x78] sm:$0xff]  ;;  %v1424_v29 = vadd.f32 %v1423_v2, %v1422_v0  ;;  %v1325_v35 = vld [vmem:[#allocation2 + $0x70] sm:$0xff] }
 0x3e3   : > { %v1399_v48 = vmul.f32 %v1362_v45, %v1319_v23  ;;  %v1406_v18 = vmul.f32 %v1390_v59, %v1326_v16  ;;  %v1489_v40 = vrot.slane %v2774_v57, 3  ;;  %v1491_v0 = vrot.slane %v2774_v57, 5 }
 0x3e4   : > { %v1437_v51 = vrot.slane %v1436_v38, 4  ;;  %v1412_v52 = vrot.slane %v1411_v47, 2  ;;  %v1432_v60 = vrot.slane %v1431_v12, 1  ;;  %v1503_v31 = vadd.f32 %v1487_v43, %v1424_v29 }
 0x3e5   : > { %v1443_v53 = vsel %vm776_vm3, %v1399_v48, 0.0  ;;  %v1471_v39 = vsel %vm776_vm3, %v1406_v18, 0.0 }
 0x3e6   : > { %v1438_v55 = vadd.f32 %v1437_v51, %v1436_v38  ;;  %v1445_v56 = vadd.f32 %v1444_v1, %v1443_v53  ;;  %v1370_v13 = vpop.permute.xlu1 %1369  ;;  %v1413_v37 = vadd.f32 %v1412_v52, %v1411_v47  ;;  %v1433_v14 = vadd.f32 %v1432_v60, %v1431_v12 }
 0x3e7   : > { %v1401_v61 = vmul.f32 %v1370_v13, %v1321_v20 }
 0x3e8   : > { %v1439_v9 = vrot.slane %v1438_v55, 2  ;;  %v1446_v62 = vrot.slane %v1445_v56, 4  ;;  %v1414_v15 = vrot.slane %v1413_v37, 1  ;;  %v1504_v36 = vadd.f32 %v1488_v58, %v1433_v14 }
 0x3e9   : > { %v1452_v63 = vsel %vm776_vm3, %v1401_v61, 0.0 }
 0x3ea   : > { %v1440_v3 = vadd.f32 %v1439_v9, %v1438_v55  ;;  %v1447_v4 = vadd.f32 %v1446_v62, %v1445_v56  ;;  %v1454_v5 = vadd.f32 %v1453_v6, %v1452_v63  ;;  %v1378_v7 = vpop.permute.xlu1 %1377  ;;  %v1415_v41 = vadd.f32 %v1414_v15, %v1413_v37  ;;  %v1536_v37 = vpop.permute.xlu0 %1535 }
 0x3eb   : > { %v1403_v17 = vmul.f32 %v1378_v7, %v1323_v10  ;;  %v1551_v49 = vmul.f32 %v1530_v26, %v1504_v36  ;;  %v1490_v62 = vrot.slane %v2774_v57, 4 }
 0x3ec   : > { %v1441_v19 = vrot.slane %v1440_v3, 1  ;;  %v1448_v21 = vrot.slane %v1447_v4, 2  ;;  %v1455_v22 = vrot.slane %v1454_v5, 4  ;;  %v1502_v55 = vadd.f32 %v2774_v57, %v1415_v41 }
 0x3ed   : > { %v1461_v28 = vsel %vm776_vm3, %v1403_v17, 0.0  ;;  %v1559_v6 = vpack.c.bf16 %v1551_v49, %v1551_v49 }
 0x3ee   : > { %v1442_v30 = vadd.f32 %v1441_v19, %v1440_v3  ;;  %v1456_v33 = vadd.f32 %v1455_v22, %v1454_v5  ;;  %v1463_v25 = vadd.f32 %v1462_v27, %v1461_v28  ;;  %v1386_v34 = vpop.permute.xlu1 %1385  ;;  %v1449_v24 = vadd.f32 %v1448_v21, %v1447_v4 }
 0x3ef   : > { %v1405_v32 = vmul.f32 %v1386_v34, %v1325_v35  ;;  %v1492_v5 = vrot.slane %v2774_v57, 6  ;;  %v1583_v18 = vunpack.c.l.b16 %v1559_v6  ;;  %v1493_v28 = vrot.slane %v2774_v57, 7 }
 0x3f0   : > { %v1457_v42 = vrot.slane %v1456_v33, 2  ;;  %v1464_v44 = vrot.slane %v1463_v25, 4  ;;  %v1450_v47 = vrot.slane %v1449_v24, 1  ;;  %v1505_v38 = vadd.f32 %v1489_v40, %v1442_v30 }
 0x3f1   : > { %v1470_v46 = vsel %vm776_vm3, %v1405_v32, 0.0  ;;  %v1592_v35 = vrot.slane %v1583_v18, 6  ;;  %v2184_v18 = vld [vmem:[%s2925_s17 + $0x18] sm:$0xff]  }
 0x3f2   : > { %v1458_v45 = vadd.f32 %v1457_v42, %v1456_v33  ;;  %v1465_v23 = vadd.f32 %v1464_v44, %v1463_v25  ;;  %v1472_v12 = vadd.f32 %v1471_v39, %v1470_v46  ;;  %v1528_v48 = vpop.permute.xlu1 %1527  ;;  %v1451_v56 = vadd.f32 %v1450_v47, %v1449_v24  ;;  %v1540_v24 = vpop.permute.xlu0 %1539 }
 0x3f3   : > { %v1550_v51 = vmul.f32 %v1528_v48, %v1503_v31  ;;  %v1552_v13 = vmul.f32 %v1532_v50, %v1505_v38 }
 0x3f4   : > { %v1459_v1 = vrot.slane %v1458_v45, 1  ;;  %v1466_v52 = vrot.slane %v1465_v23, 2  ;;  %v1473_v53 = vrot.slane %v1472_v12, 4  ;;  %v1506_v4 = vadd.f32 %v1490_v62, %v1451_v56  ;;  %v2180_v62 = vld [vmem:[%s2923_s15 + $0x8] sm:$0xff]  }
 0x3f5   : > { %v1558_v54 = vpack.c.bf16 %v1550_v51, %v1550_v51  ;;  %v1560_v7 = vpack.c.bf16 %v1552_v13, %v1552_v13 }
 0x3f6   : > { %v1460_v20 = vadd.f32 %v1459_v1, %v1458_v45  ;;  %v1474_v59 = vadd.f32 %v1473_v53, %v1472_v12  ;;  %v1526_v60 = vpop.permute.xlu1 %1525  ;;  %v1467_v61 = vadd.f32 %v1466_v52, %v1465_v23  ;;  %v2241_v53 = vld [vmem:[%s2464_s24] sm:$0xff]  ;;  %s1998_s24 = sshll.u32 %s591_s27, 3 }
 0x3f7   : > { %v1549_v9 = vmul.f32 %v1526_v60, %v1502_v55  ;;  %v1582_v63 = vunpack.c.l.b16 %v1558_v54  ;;  %v1584_v25 = vunpack.c.l.b16 %v1560_v7  ;;  %s593_s22 = scalar_lea.vmem [#allocation4], %s1998_s24  ;;  %s2246_s24 = sshll.u32 %s2310_s1, 4  ;;  %s2247_s24 = int_to_ptr.vmem [resolvable:$false] %s2246_s24 }
 0x3f8   : > { %v1507_v11 = vadd.f32 %v1491_v0, %v1460_v20  ;;  %v1475_v16 = vrot.slane %v1474_v59, 2  ;;  %v1468_v2 = vrot.slane %v1467_v61, 1  ;;  %s1935_s23 = sshll.u32 %s593_s22, 4  ;;  %s2248_s29 = scalar_lea.vmem %s2247_s24, 256  ;;  %s2867_s23 = int_to_ptr.vmem [resolvable:$true] %s1935_s23 }
 0x3f9   : > { %v1557_v3 = vpack.c.bf16 %v1549_v9, %v1549_v9  ;;  %v1589_v27 = vrot.slane %v1582_v63, 7  ;;  %v1595_v46 = vrot.slane %v1584_v25, 5  ;;  %v2179_v9 = vld [vmem:[%s2923_s15] sm:$0xff]   ;;  %s2242_s2 = scalar_lea.vmem %s2867_s23, 128  ;;  %p2249_p0 = scmp.lt.s32.totalorder %s2867_s23, %s2247_s24 }
 0x3fa   : > { %v1554_v10 = vmul.f32 %v1536_v37, %v1507_v11  ;;  %v1476_v58 = vadd.f32 %v1475_v16, %v1474_v59  ;;  %v1534_v14 = vpop.permute.xlu1 %1533  ;;  %v1469_v17 = vadd.f32 %v1468_v2, %v1467_v61  ;;  %v2181_v11 = vld [vmem:[%s2925_s17] sm:$0xff]   ;;  %p2243_p11 = scmp.ne.s32.totalorder %s2867_s23, %s2242_s2  ;;  %p2250_p1 = scmp.lt.s32.totalorder %s2248_s29, %s2242_s2 }
 0x3fb   : > { %v1581_v19 = vunpack.c.l.b16 %v1557_v3  ;;  %v1553_v21 = vmul.f32 %v1534_v14, %v1506_v4  ;;  %2107 = vmatpush3.bf16.msra.mxu0 %v2181_v11  ;;  %v2020_v3 = vld [vmem:[%s2919_s11] ss:$0 sm:$0xff]  ;;  %v2182_v14 = vld [vmem:[%s2925_s17 + $0x8] sm:$0xff]  }
 0x3fc   : > { %v1477_v22 = vrot.slane %v1476_v58, 1  ;;  %v1508_v26 = vadd.f32 %v1492_v5, %v1469_v17  ;;  %v1562_v15 = vpack.c.bf16 %v1554_v10, %v1554_v10  ;;  %2108 = vmatprep.subr.bf16.mxu0 %v2306_v8  ;;  %v2021_v5 = vld [vmem:[%s2920_s12] ss:$0 sm:$0xff]  ;;  %v2183_v17 = vld [vmem:[%s2925_s17 + $0x10] sm:$0xff]   ;;  %p2244_p12 = pnand %p2243_p11, %p2449_p5  ;;  %p2251_p2 = por %p2250_p1, %p2249_p0 }
 0x3fd   : > { %v1561_v29 = vpack.c.bf16 %v1553_v21, %v1553_v21  ;;  %v1591_v33 = vsel %vm1590_vm5, %v1589_v27, %v1581_v19  ;;  %v2185_v19 = vld [vmem:[%s2925_s17 + $0x20] sm:$0xff]   ;;  %v2186_v21 = vld [vmem:[%s2925_s17 + $0x28] sm:$0xff]   ;;  %v2188_v27 = vld [vmem:[%s2925_s17 + $0x38] sm:$0xff]  }
 0x3fe   : > { %v1478_v30 = vadd.f32 %v1477_v22, %v1476_v58  ;;  %v1538_v34 = vpop.permute.xlu1 %1537  ;;  %v1594_v39 = vsel %vm1593_vm6, %v1592_v35, %v1591_v33  ;;  %v1586_v57 = vunpack.c.l.b16 %v1562_v15  ;;  %v2187_v22 = vld [vmem:[%s2925_s17 + $0x30] sm:$0xff]   ;;  %p2245_p13 = pneg %p2244_p12 }
 0x3ff   : > { %v1585_v36 = vunpack.c.l.b16 %v1561_v29  ;;  %v1555_v32 = vmul.f32 %v1538_v34, %v1508_v26  ;;  %v1597_v47 = vsel %vm1596_vm7, %v1595_v46, %v1594_v39  ;;  %2109 = vmatpush3.bf16.msra.mxu0 %v2182_v14  ;;  %v2022_v26 = vld [vmem:[%s2924_s16] ss:$0 sm:$0xff] }
 0x400   : > { %v1509_v43 = vadd.f32 %v1493_v28, %v1478_v30  ;;  %v1601_v12 = vrot.slane %v1586_v57, 3  ;;  %2110 = vmatprep.subr.bf16.mxu0 %v2306_v8  ;;  %p2252_p3 = pnand %p2251_p2, %p2245_p13 }
 0x401   : > { %v1598_v40 = vrot.slane %v1585_v36, 4  ;;  %v1563_v42 = vpack.c.bf16 %v1555_v32, %v1555_v32 }
 0x402   : > { %v1556_v44 = vmul.f32 %v1540_v24, %v1509_v43 }
 0x403   : > { %v1587_v31 = vunpack.c.l.b16 %v1563_v42  ;;  %v1600_v38 = vsel %vm1599_vm8, %v1598_v40, %v1597_v47  ;;  %2111 = vmatpush3.bf16.msra.mxu0 %v2183_v17  ;;  %v2026_v42 = vld [vmem:[%s2926_s18] ss:$0 sm:$0xff] }
 0x404   : > { %v1564_v41 = vpack.c.bf16 %v1556_v44, %v1556_v44  ;;  %v1603_v48 = vsel %vm1602_vm9, %v1601_v12, %v1600_v38  ;;  %2112 = vmatprep.subr.bf16.mxu0 %v2306_v8 }
 0x405   : > { %v1604_v45 = vrot.slane %v1587_v31, 2 }
 0x406   : > { %v1588_v23 = vunpack.c.l.b16 %v1564_v41 }
 0x407   : > { %v1606_v50 = vsel %vm1605_vm10, %v1604_v45, %v1603_v48  ;;  %2113 = vmatpush3.bf16.msra.mxu0 %v2184_v18 }
 0x408   : > { %v1607_v49 = vrot.slane %v1588_v23, 1  ;;  %2114 = vmatprep.subr.bf16.mxu0 %v2306_v8 }
 0x40a   : > { %v1609_v51 = vsel %vm1608_vm11, %v1607_v49, %v1606_v50 }
 0x40b   : > { %v1610_v1 = vpack.c.b16 %v1609_v51, %v1609_v51  ;;  %2115 = vmatpush3.bf16.msra.mxu0 %v2185_v19 }
 0x40c   : > { %2116 = vmatprep.subr.bf16.mxu0 %v2306_v8 }
 0x40d   : > { %2095 = vmatmul.mubr.msk.bf16.vlgmr.msra.gmra.mrb[4].mxu1 %vm776_vm3, %v1610_v1 }
 0x40e   : > { %2102 = vmatprep.mubr.msk.bf16.mxu1 %vm2307_vm1, %v2306_v8  ;;  %2099 = vmatpush3.bf16.msra.mxu1 %v2179_v9 }
 0x40f   : > { %2100 = vmatprep.subr.bf16.mxu1 %v2306_v8  ;;  %2117 = vmatpush3.bf16.msra.mxu0 %v2186_v21 }
 0x410   : > { %2118 = vmatprep.subr.bf16.mxu0 %v2306_v8 }
 0x412   : > { %2101 = vmatpush3.bf16.msra.mxu1 %v2180_v62 }
 0x413   : > { %2119 = vmatpush3.bf16.msra.mxu0 %v2187_v22 }
 0x414   : > { %2120 = vmatprep.subr.bf16.mxu0 %v2306_v8 }
 0x417   : > { %2121 = vmatpush3.bf16.msra.mxu0 %v2188_v27 }
 0x4e0   : > { %v1672_v52 = vpop.f32.mrb[4].mxu1 }
 0x4e1   : > { %v2794_v0 = vadd.f32 %v2241_v53, %v1672_v52  ;;  %v2096_v54 = vpop.f32.mrb[5].mxu1  ;;  %v2035_v53 = vld [vmem:[%s2921_s13] ss:$0 sm:$0xff] }
 0x4e2   : > { %v1675_v55 = vpop.f32.mrb[6].mxu1  ;;  %v2036_v54 = vld [vmem:[%s2922_s14] ss:$0 sm:$0xff] }
 0x4e3   : > { %v2097_v56 = vpop.f32.mrb[7].mxu1  ;;  %v1679_v13 = vsel %vm602_vm0, %v2794_v0, 0.0 }
 0x4e4   : > { %1680 = vadd.xlane.f32.xlu1 %v1679_v13 }
 0x571   : > { %v1681_v20 = vpop.xlane.xlu1 %1680 }
 0x572   : > { %v1682_v59 = vmul.f32 0.03125, %v1681_v20 }
 0x574   : > { %v1683_v60 = vsub.f32 %v2794_v0, %v1682_v59 }
 0x576   : > { %v1684_v61 = vmul.f32 %v1683_v60, %v1683_v60 }
 0x578   : > { %v1685_v6 = vsel %vm602_vm0, %v1684_v61, 0.0 }
 0x579   : > { %1686 = vadd.xlane.f32.xlu0 %v1685_v6 }
 0x606   : > { %v1687_v16 = vpop.xlane.xlu0 %1686 }
 0x607   : > { %v1688_v63 = vmul.f32 0.03125, %v1687_v16 }
 0x609   : > { %v1689_v2 = vadd.f32 1e-05, %v1688_v63 }
 0x60b   : > { %2235 = vrsqrt.f32 %v1689_v2 }
 0x615   : > { %v2236_v37 = vpop.eup %2235 }
 0x616   : > { %v1691_v4 = vmul.f32 %v2236_v37, %v1683_v60 }
 0x618   : > { %v1698_v7 = vmul.f32 %v2020_v3, %v1691_v4 }
 0x61a   : > { %v1705_v10 = vadd.f32 %v2021_v5, %v1698_v7 }
 0x61c   : > { %v1706_v58 = vpack.c.bf16 %v1705_v10, %v1705_v10 }
 0x61e   : > { %2103 = vmatmul.mubr.msk.bf16.vlgmr.msra.gmra.mrb[8].mxu1 %vm602_vm0, %v1706_v58 }
 0x6f1   : > { %v1766_v28 = vpop.f32.mrb[8].mxu1 }
 0x6f2   : > { %v1767_v29 = vadd.f32 %v2022_v26, %v1766_v28  ;;  %v2104_v15 = vpop.f32.mrb[9].mxu1 }
 0x6f3   : > { %v1769_v30 = vpop.f32.mrb[10].mxu1 }
 0x6f4   : > { %v1773_v33 = vmul.f32 0.044715, %v1767_v29  ;;  %v2105_v25 = vpop.f32.mrb[11].mxu1  ;;  %v1772_v24 = vmul.f32 0.5, %v1767_v29 }
 0x6f6   : > { %v1774_v34 = vmul.f32 %v1773_v33, %v1767_v29 }
 0x6f8   : > { %v1775_v35 = vmul.f32 %v1774_v34, %v1767_v29 }
 0x6fa   : > { %v1776_v36 = vadd.f32 %v1775_v35, %v1767_v29 }
 0x6fc   : > { %v1777_v32 = vmul.f32 0.7978846, %v1776_v36 }
 0x6fe   : > { %2237 = vtanh.f32 %v1777_v32 }
 0x708   : > { %v2238_v43 = vpop.eup %2237 }
 0x709   : > { %v1779_v39 = vadd.f32 1.0, %v2238_v43 }
 0x70b   : > { %v1780_v8 = vmul.f32 %v1779_v39, %v1772_v24 }
 0x70d   : > { %v1781_v40 = vpack.c.bf16 %v1780_v8, %v1780_v8 }
 0x70f   : > { %2123 = vmatmul.mubr.bf16.vlgmr.msra.gmra.mrb[4].mxu0 %v1781_v40 }
 0x7e2   : > { %v1886_v44 = vpop.f32.mrb[4].mxu0 }
 0x7e3   : > { %v1887_v46 = vadd.f32 %v2026_v42, %v1886_v44  ;;  %v2124_v57 = vpop.f32.mrb[5].mxu0 }
 0x7e4   : > { %v1889_v31 = vpop.f32.mrb[6].mxu0 }
 0x7e5   : > { %v2125_v41 = vpop.f32.mrb[7].mxu0  ;;  %v1892_v47 = vadd.f32 %v1887_v46, %v2794_v0 }
 0x7e7   : > { %v1893_v38 = vsel %vm602_vm0, %v1892_v47, 0.0 }
 0x7e8   : > { %1894 = vadd.xlane.f32.xlu0 %v1893_v38 }
 0x875   : > { %v1895_v45 = vpop.xlane.xlu0 %1894 }
 0x876   : > { %v1896_v23 = vmul.f32 0.03125, %v1895_v45 }
 0x878   : > { %v1897_v12 = vsub.f32 %v1892_v47, %v1896_v23 }
 0x87a   : > { %v1898_v48 = vmul.f32 %v1897_v12, %v1897_v12 }
 0x87c   : > { %v1899_v49 = vsel %vm602_vm0, %v1898_v48, 0.0 }
 0x87d   : > { %1900 = vadd.xlane.f32.xlu1 %v1899_v49 }
 0x90a   : > { %v1901_v50 = vpop.xlane.xlu1 %1900 }
 0x90b   : > { %v1902_v51 = vmul.f32 0.03125, %v1901_v50 }
 0x90d   : > { %v1903_v1 = vadd.f32 1e-05, %v1902_v51 }
 0x90f   : > { %2239 = vrsqrt.f32 %v1903_v1 }
 0x919   : > { %v2240_v52 = vpop.eup %2239 }
 0x91a   : > { %v1905_v0 = vmul.f32 %v2240_v52, %v1897_v12 }
 0x91c   : > { %v1912_v55 = vmul.f32 %v2035_v53, %v1905_v0 }
 0x91e   : > { %v1919_v56 = vadd.f32 %v2036_v54, %v1912_v55 }
 0x920   : > { %1920 = vst.msk [vmem:[%s593_s22] sm:$0xff] %vm602_vm0, %v1919_v56 }
 0x921   : > { %2255 = shalt.err (!%p2252_p3)
}
 0x922   : > { %s2256_s4 = scalar_lea.hbm %s2865_s6, 128  ;;  %s2260_s25 = scalar_lea.hbm %s2927_s19, 256 }
 0x923   : > { %p2257_p4 = scmp.ne.s32.totalorder %s2865_s6, %s2256_s4  ;;  %p2261_p9 = scmp.lt.u32.totalorder %s2865_s6, %s2927_s19 }
 0x924   : > { %p2262_p10 = scmp.lt.u32.totalorder %s2260_s25, %s2256_s4  ;;  %p2264_p12 = scmp.lt.u32.totalorder %s2256_s4, %s2865_s6 }
 0x925   : > { %p2258_p7 = pnand %p2257_p4, %p2449_p5 }
 0x926   : > { %p2263_p11 = por %p2262_p10, %p2261_p9 }
 0x927   : > { %p2259_p8 = pneg %p2258_p7 }
 0x928   : > { %p2265_p13 = por %p2264_p12, %p2263_p11 }
 0x92a   : > { %p2266_p0 = pnand %p2265_p13, %p2259_p8 }
 0x92c   : > { %2269 = shalt.err (!%p2266_p0)
}
 0x92d   : > { %2126 = dma.vmem_to_hbm [thread:$0]  (%p2449_p5), %s2867_s23, 128, %s2865_s6, %s1922_s28  }
 0x92e PF: > { %p2132_p1 = scmp.ge.s32.totalorder %s2304_s21, 2  ;;  %s1947_s2 = sand.u32 1, %s2292_s0  }
 0x92f   : > { %s1948_s1 = scalar_lea.sflag [#allocation5], %s1947_s2 }
 0x930   : > { %p2129_p2 = pnand %p2132_p1, %p2453_p6 }
 0x932   : > { %2287 = dma.done.wait (!%p2129_p2), %s1948_s1, 128  }
 0x933   : > { %2289 = vsyncadd (!%p2129_p2), %s1948_s1, 4294967168  ;;  %s2953_s21 = sld [smem:[#allocation8_spill]]  ;;  %s2954_s24 = sld [smem:[#allocation7_spill]] }
 0x934   : > { %s2955_s20 = sld [smem:[#allocation9_spill]]  ;;  %s2956_s0 = smov %s2296_s30 }
 0x939   : > { %p29_p3 = scmp.ge.s32.totalorder %s2953_s21, 4   ;;  %s2957_s30 = smov %s2954_s24 }
 0x93b   :  { %31 = sbr.rel (!%p29_p3) target bundleno = 11 (0xb), region = 145 }
 0x942   :  { %1953 = vsyncpa [#allocation5], 1 }
 0x943   :  { %1955 = vsyncpa [#allocation5 + $0x1], 1 }

</bundles_post_ra>
